<compile_context>
chip_gen: v7x
topology: tpu7x:2x2x1
jax: 0.10.0
libtpu: 0.0.40
codegen_flags: <defaults>
</compile_context>

<pallas_src>
import functools

import jax
import jax.numpy as jnp
from jax.experimental import pallas as pl
from jax.experimental.pallas import tpu as pltpu

LANE = 128


# ----------------------------------------------------------------------------
# helpers
# ----------------------------------------------------------------------------
def _round_up(a, b):
    return (a + b - 1) // b * b


def _pad2d(a, rows, cols):
    return jnp.pad(a, ((0, rows - a.shape[0]), (0, cols - a.shape[1])))


def _pick_divisor(total, candidates):
    for c in candidates:
        if c <= total and total % c == 0:
            return c
    return min(total, LANE)


def _layernorm_masked(h, gamma, beta, f_true, eps=1e-5):
    """LayerNorm over a zero-padded lane dim using the true feature count.

    Two-pass variance with an explicit lane mask so padded lanes do not
    contribute to the statistics; padded gamma/beta are zero so padded output
    lanes stay zero.
    """
    inv_f = 1.0 / float(f_true)
    lane = jax.lax.broadcasted_iota(jnp.int32, h.shape, dimension=h.ndim - 1)
    mask = lane < f_true
    mu = jnp.sum(h, axis=-1, keepdims=True) * inv_f
    d = jnp.where(mask, h - mu, 0.0)
    var = jnp.sum(d * d, axis=-1, keepdims=True) * inv_f
    return (h - mu) * jax.lax.rsqrt(var + eps) * gamma + beta


# ----------------------------------------------------------------------------
# kernels
# ----------------------------------------------------------------------------
def _conv1_kernel(adj_ref, x_ref, g0_ref, be0_ref, w1_ref, b1_ref,
                  g1_ref, be1_ref, w2_ref, out_ref, acc_ref,
                  *, tk, fin_true, hid_true):
    """Fused: LN_in + GCNConv1 aggregation + bias + ReLU + LN_hidden + @W2.

    Per (row-tile i, k-tile k):
      acc[i] += adj[i,k] @ (LN_in(x[k]) @ W1)
    Finalize at last k:
      out[i] = LN_hidden(relu(acc[i] + b1)) @ W2        (bf16)
    """
    k = pl.program_id(1)

    @pl.when(k == 0)
    def _():
        acc_ref[...] = jnp.zeros_like(acc_ref)

    start = pl.multiple_of(k * tk, tk)
    xk = x_ref[pl.ds(start, tk), :].astype(jnp.float32)
    xk = _layernorm_masked(xk, g0_ref[...], be0_ref[...], fin_true)
    xw1 = jnp.dot(xk, w1_ref[...],
                  preferred_element_type=jnp.float32).astype(jnp.bfloat16)
    acc_ref[...] += jnp.dot(adj_ref[...], xw1,
                            preferred_element_type=jnp.float32)

    @pl.when(k == pl.num_programs(1) - 1)
    def _():
        h = jnp.maximum(acc_ref[...] + b1_ref[...], 0.0)
        h = _layernorm_masked(h, g1_ref[...], be1_ref[...], hid_true)
        out_ref[...] = jnp.dot(
            h, w2_ref[...], preferred_element_type=jnp.float32
        ).astype(out_ref.dtype)


def _conv2_kernel(adj_ref, hw_ref, b2_ref, g2_ref, be2_ref,
                  out_ref, acc_ref, *, tk, out_true):
    """GCNConv2 aggregation + bias + ReLU + LN_out.

    Per (row-tile i, k-tile k):
      acc[i] += adj[i,k] @ hw2[k]
    Finalize at last k:
      out[i] = LN_out(relu(acc[i] + b2))                (f32)
    """
    k = pl.program_id(1)

    @pl.when(k == 0)
    def _():
        acc_ref[...] = jnp.zeros_like(acc_ref)

    start = pl.multiple_of(k * tk, tk)
    acc_ref[...] += jnp.dot(adj_ref[...], hw_ref[pl.ds(start, tk), :],
                            preferred_element_type=jnp.float32)

    @pl.when(k == pl.num_programs(1) - 1)
    def _():
        h = jnp.maximum(acc_ref[...] + b2_ref[...], 0.0)
        out_ref[...] = _layernorm_masked(
            h, g2_ref[...], be2_ref[...], out_true).astype(out_ref.dtype)


# ----------------------------------------------------------------------------
# pallas_call wrappers
# ----------------------------------------------------------------------------
def _vmem_limit(np_, tm, tk, fin_p, h_p, o_p):
    """Estimate VMEM footprint; return explicit limit only when it is needed."""
    bf, f32 = 2, 4
    est = (2 * tm * tk * bf                          # adj tile, double-buffered
           + 2 * np_ * max(fin_p, o_p) * bf          # resident activations
           + 2 * (fin_p * h_p + h_p * o_p) * f32     # resident weights
           + 2 * 8 * max(fin_p, h_p, o_p) * f32      # LN params / biases
           + tm * max(h_p, o_p) * f32                # f32 accumulator
           + 2 * tm * o_p * f32)                     # output block
    est = int(est * 1.3) + (2 << 20)
    if est <= (24 << 20):
        return None                                  # scoped default is enough
    try:
        cap = int(pltpu.get_tpu_info().vmem_capacity_bytes * 3 // 4)
    except Exception:
        cap = 64 << 20                               # safe on v7x (64 MiB phys)
    return min(est, cap)


def _conv1_call(adj_p, x_p, g0, be0, w1, b1, g1, be1, w2,
                tm, tk, fin_true, hid_true, vmem_limit):
    np_ = adj_p.shape[0]
    fin_p, h_p = w1.shape
    o_p = w2.shape[1]
    return pl.pallas_call(
        functools.partial(_conv1_kernel, tk=tk, fin_true=fin_true,
                          hid_true=hid_true),
        out_shape=jax.ShapeDtypeStruct((np_, o_p), jnp.bfloat16),
        grid_spec=pltpu.PrefetchScalarGridSpec(
            num_scalar_prefetch=0,
            grid=(np_ // tm, np_ // tk),
            in_specs=[
                pl.BlockSpec((tm, tk), lambda i, k: (i, k)),       # adj (streamed)
                pl.BlockSpec((np_, fin_p), lambda i, k: (0, 0)),   # x   (resident)
                pl.BlockSpec((1, fin_p), lambda i, k: (0, 0)),     # LN_in gamma
                pl.BlockSpec((1, fin_p), lambda i, k: (0, 0)),     # LN_in beta
                pl.BlockSpec((fin_p, h_p), lambda i, k: (0, 0)),   # W1
                pl.BlockSpec((1, h_p), lambda i, k: (0, 0)),       # b1
                pl.BlockSpec((1, h_p), lambda i, k: (0, 0)),       # LN_h gamma
                pl.BlockSpec((1, h_p), lambda i, k: (0, 0)),       # LN_h beta
                pl.BlockSpec((h_p, o_p), lambda i, k: (0, 0)),     # W2
            ],
            out_specs=pl.BlockSpec((tm, o_p), lambda i, k: (i, 0)),
            scratch_shapes=[pltpu.VMEM((tm, h_p), jnp.float32)],
        ),
        compiler_params=pltpu.CompilerParams(
            dimension_semantics=("parallel", "arbitrary"),
            vmem_limit_bytes=vmem_limit),
    )(adj_p, x_p, g0, be0, w1, b1, g1, be1, w2)


def _conv2_call(adj_p, hw_p, b2, g2, be2, tm, tk, out_true, vmem_limit):
    np_ = adj_p.shape[0]
    o_p = hw_p.shape[1]
    return pl.pallas_call(
        functools.partial(_conv2_kernel, tk=tk, out_true=out_true),
        out_shape=jax.ShapeDtypeStruct((np_, o_p), jnp.float32),
        grid_spec=pltpu.PrefetchScalarGridSpec(
            num_scalar_prefetch=0,
            grid=(np_ // tm, np_ // tk),
            in_specs=[
                pl.BlockSpec((tm, tk), lambda i, k: (i, k)),       # adj (streamed)
                pl.BlockSpec((np_, o_p), lambda i, k: (0, 0)),     # hw2 (resident)
                pl.BlockSpec((1, o_p), lambda i, k: (0, 0)),       # b2
                pl.BlockSpec((1, o_p), lambda i, k: (0, 0)),       # LN_out gamma
                pl.BlockSpec((1, o_p), lambda i, k: (0, 0)),       # LN_out beta
            ],
            out_specs=pl.BlockSpec((tm, o_p), lambda i, k: (i, 0)),
            scratch_shapes=[pltpu.VMEM((tm, o_p), jnp.float32)],
        ),
        compiler_params=pltpu.CompilerParams(
            dimension_semantics=("parallel", "arbitrary"),
            vmem_limit_bytes=vmem_limit),
    )(adj_p, hw_p, b2, g2, be2)


# ----------------------------------------------------------------------------
# graph normalization (plain JAX glue, matches PyG gcn_norm for unweighted graphs)
# ----------------------------------------------------------------------------
def gcn_norm_adj(edge_index, num_nodes):
    """Dense D^{-1/2}(A + I)D^{-1/2}: duplicates summed, remaining self-loops added."""
    src, dst = edge_index[0], edge_index[1]
    A = jnp.zeros((num_nodes, num_nodes), jnp.float32)
    # message flows src -> dst  =>  out[dst] += x[src]  =>  A_hat[dst, src]
    A = A.at[dst, src].add(1.0)
    idx = jnp.arange(num_nodes)
    diag = A[idx, idx]
    A = A.at[idx, idx].add(jnp.where(diag > 0.0, 0.0, 1.0))   # add_remaining_self_loops
    deg = A.sum(axis=1)
    d_inv_sqrt = jnp.where(deg > 0.0, jax.lax.rsqrt(deg), 0.0)
    return d_inv_sqrt[:, None] * A * d_inv_sqrt[None, :]


def prepare_adjacency(edge_index, num_nodes, num_nodes_padded):
    """Build, cast and pad A_hat once; cacheable when the graph is static."""
    adj = gcn_norm_adj(edge_index, num_nodes).astype(jnp.bfloat16)
    return _pad2d(adj, num_nodes_padded, num_nodes_padded)


# ----------------------------------------------------------------------------
# forward
# ----------------------------------------------------------------------------
def inter_gcn_forward(x, edge_index, params):
    n, fin = x.shape
    hid = params["w1"].shape[1]
    out = params["w2"].shape[1]

    # lane-dense feature padding
    fin_p = _round_up(fin, LANE)
    h_p = _round_up(hid, LANE)
    o_p = _round_up(out, LANE)

    # tight node padding (lane granularity) + divisor-aware tile selection
    np_ = max(_round_up(n, LANE), LANE)
    tm = _pick_divisor(np_, (512, 256, 128))
    if np_ >= 2 * LANE:
        tm = min(tm, np_ // 2)          # >= 2 row tiles so v7x can use both TCs
    tk = _pick_divisor(np_, (2048, 1024, 512, 256, 128))

    vmem_limit = _vmem_limit(np_, tm, tk, fin_p, h_p, o_p)

    # dense normalized adjacency, streamed in bf16 (build once per graph)
    adj_p = prepare_adjacency(edge_index, n, np_)

    # bf16 node features (f32 math is restored inside the kernel for LN/matmul acc)
    x_p = _pad2d(x.astype(jnp.bfloat16), np_, fin_p)
    w1_p = _pad2d(params["w1"], fin_p, h_p)
    b1_p = _pad2d(params["b1"], 1, h_p)
    w2_p = _pad2d(params["w2"], h_p, o_p)
    b2_p = _pad2d(params["b2"], 1, o_p)
    g0_p = _pad2d(params["g0"], 1, fin_p)
    be0_p = _pad2d(params["be0"], 1, fin_p)
    g1_p = _pad2d(params["g1"], 1, h_p)
    be1_p = _pad2d(params["be1"], 1, h_p)
    g2_p = _pad2d(params["g2"], 1, o_p)
    be2_p = _pad2d(params["be2"], 1, o_p)

    # (1) hw2 = LN_hidden(relu(A_hat @ (LN_in(x) @ W1) + b1)) @ W2   -> bf16
    hw2 = _conv1_call(adj_p, x_p, g0_p, be0_p, w1_p, b1_p, g1_p, be1_p, w2_p,
                      tm, tk, fin, hid, vmem_limit)
    # (2) out = LN_out(relu(A_hat @ hw2 + b2))                        -> f32
    out_p = _conv2_call(adj_p, hw2, b2_p, g2_p, be2_p, tm, tk, out, vmem_limit)

    return out_p[:n, :out]


# ----------------------------------------------------------------------------
# reference (pure JAX, f32) and params
# ----------------------------------------------------------------------------
def inter_gcn_reference(x, edge_index, params):
    def ln(v, g, b, eps=1e-5):
        mu = jnp.mean(v, axis=-1, keepdims=True)
        var = jnp.mean((v - mu) ** 2, axis=-1, keepdims=True)
        return (v - mu) * jax.lax.rsqrt(var + eps) * g + b

    adj = gcn_norm_adj(edge_index, x.shape[0])
    v = ln(x.astype(jnp.float32), params["g0"], params["be0"])
    v = adj @ (v @ params["w1"]) + params["b1"]
    v = ln(jnp.maximum(v, 0.0), params["g1"], params["be1"])
    v = adj @ (v @ params["w2"]) + params["b2"]
    v = ln(jnp.maximum(v, 0.0), params["g2"], params["be2"])
    return v


def init_params(key, in_feats, n_hidden, out_feats):
    k1, k2 = jax.random.split(key)

    def glorot(k, fan_in, fan_out):
        lim = jnp.sqrt(6.0 / (fan_in + fan_out))
        return jax.random.uniform(k, (fan_in, fan_out), jnp.float32, -lim, lim)

    return {
        "w1": glorot(k1, in_feats, n_hidden),
        "b1": jnp.zeros((1, n_hidden), jnp.float32),
        "w2": glorot(k2, n_hidden, out_feats),
        "b2": jnp.zeros((1, out_feats), jnp.float32),
        # LayerNorm params (torch default: weight=1, bias=0)
        "g0": jnp.ones((1, in_feats), jnp.float32),
        "be0": jnp.zeros((1, in_feats), jnp.float32),
        "g1": jnp.ones((1, n_hidden), jnp.float32),
        "be1": jnp.zeros((1, n_hidden), jnp.float32),
        "g2": jnp.ones((1, out_feats), jnp.float32),
        "be2": jnp.zeros((1, out_feats), jnp.float32),
    }


if __name__ == "__main__":
    in_feats, n_hidden, out_feats = 32, 16, 8
    num_nodes = 8

    key = jax.random.PRNGKey(0)
    kx, kp = jax.random.split(key)

    x = jax.random.normal(kx, (num_nodes, in_feats), jnp.float32)
    # small deterministic graph: bidirectional ring over 8 nodes
    src = jnp.arange(num_nodes, dtype=jnp.int32)
    dst = (src + 1) % num_nodes
    edge_index = jnp.stack(
        [jnp.concatenate([src, dst]), jnp.concatenate([dst, src])], axis=0)

    params = init_params(kp, in_feats, n_hidden, out_feats)

    fea = inter_gcn_forward(x, edge_index, params)
    jax.block_until_ready(fea)
    assert fea.shape == (num_nodes, out_feats)

    ref = inter_gcn_reference(x, edge_index, params)
    err = float(jnp.max(jnp.abs(fea - ref)))
    assert jnp.allclose(fea, ref, atol=5e-2, rtol=5e-2), f"max abs err={err}"

    print("KERNEL_OK")
</pallas_src>

<mosaic_0001>
module attributes {stable_mosaic.version = 11 : i64} {
  func.func @_conv1_kernel(%arg0: i32, %arg1: i32, %arg2: memref<128x128xbf16, #tpu.memory_space<vmem>>, %arg3: memref<128x128xbf16, #tpu.memory_space<vmem>>, %arg4: memref<1x128xf32, #tpu.memory_space<vmem>>, %arg5: memref<1x128xf32, #tpu.memory_space<vmem>>, %arg6: memref<128x128xf32, #tpu.memory_space<vmem>>, %arg7: memref<1x128xf32, #tpu.memory_space<vmem>>, %arg8: memref<1x128xf32, #tpu.memory_space<vmem>>, %arg9: memref<1x128xf32, #tpu.memory_space<vmem>>, %arg10: memref<128x128xf32, #tpu.memory_space<vmem>>, %arg11: memref<128x128xbf16, #tpu.memory_space<vmem>>, %arg12: memref<128x128xf32, #tpu.memory_space<vmem>>) attributes {dimension_semantics = [#tpu.dimension_semantics<parallel>, #tpu.dimension_semantics<arbitrary>], iteration_bounds = array<i64: 1, 1>, scalar_prefetch = 0 : i64, scratch_operands = 1 : i64, tpu.core_type = #tpu.core_type<tc>, window_params = [{transform_indices = @transform_0, window_bounds = array<i64: 128, 128>}, {pipeline_mode = #tpu.pipeline_mode<synchronous>, transform_indices = @transform_1, window_bounds = array<i64: 128, 128>}, {pipeline_mode = #tpu.pipeline_mode<synchronous>, transform_indices = @transform_2, window_bounds = array<i64: 1, 128>}, {pipeline_mode = #tpu.pipeline_mode<synchronous>, transform_indices = @transform_3, window_bounds = array<i64: 1, 128>}, {pipeline_mode = #tpu.pipeline_mode<synchronous>, transform_indices = @transform_4, window_bounds = array<i64: 128, 128>}, {pipeline_mode = #tpu.pipeline_mode<synchronous>, transform_indices = @transform_5, window_bounds = array<i64: 1, 128>}, {pipeline_mode = #tpu.pipeline_mode<synchronous>, transform_indices = @transform_6, window_bounds = array<i64: 1, 128>}, {pipeline_mode = #tpu.pipeline_mode<synchronous>, transform_indices = @transform_7, window_bounds = array<i64: 1, 128>}, {pipeline_mode = #tpu.pipeline_mode<synchronous>, transform_indices = @transform_8, window_bounds = array<i64: 128, 128>}, {transform_indices = @transform_9, window_bounds = array<i64: 128, 128>}]} {
    %c0_i32 = arith.constant 0 : i32
    %0 = arith.cmpi eq, %arg1, %c0_i32 : i32
    %1 = arith.extui %0 : i1 to i32
    %c0_i32_0 = arith.constant 0 : i32
    %2 = arith.cmpi ne, %1, %c0_i32_0 : i32
    scf.if %2 {
      %cst_22 = arith.constant 0.000000e+00 : f32
      %48 = vector.broadcast %cst_22 : f32 to vector<128x128xf32>
      %c0_23 = arith.constant 0 : index
      %c0_24 = arith.constant 0 : index
      %49 = vector.load %arg12[%c0_23, %c0_24] : memref<128x128xf32, #tpu.memory_space<vmem>>, vector<128x128xf32>
      tpu.vector_store %arg12[%c0_23, %c0_24], %48 {strides = array<i32>} : memref<128x128xf32, #tpu.memory_space<vmem>>, vector<128x128xf32>,
    } else {
    }
    %c128_i32 = arith.constant 128 : i32
    %3 = arith.muli %arg1, %c128_i32 : i32
    %4 = tpu.assume_multiple %3, 128 : i32
    %5 = arith.index_cast %4 : i32 to index
    %c0 = arith.constant 0 : index
    %6 = vector.load %arg3[%5, %c0] : memref<128x128xbf16, #tpu.memory_space<vmem>>, vector<128x128xbf16>
    %7 = arith.extf %6 : vector<128x128xbf16> to vector<128x128xf32>
    %c0_1 = arith.constant 0 : index
    %c0_2 = arith.constant 0 : index
    %8 = vector.load %arg4[%c0_1, %c0_2] : memref<1x128xf32, #tpu.memory_space<vmem>>, vector<1x128xf32>
    %c0_3 = arith.constant 0 : index
    %c0_4 = arith.constant 0 : index
    %9 = vector.load %arg5[%c0_3, %c0_4] : memref<1x128xf32, #tpu.memory_space<vmem>>, vector<1x128xf32>
    %10 = tpu.iota {dimensions = array<i32: 1>} : vector<128x128xi32>
    %c32_i32 = arith.constant 32 : i32
    %11 = vector.broadcast %c32_i32 : i32 to vector<128x128xi32>
    %12 = arith.cmpi slt, %10, %11 : vector<128x128xi32>
    %cst = arith.constant dense<0.000000e+00> : vector<128xf32>
    %13 = vector.multi_reduction <add>, %7, %cst [1] : vector<128x128xf32> to vector<128xf32>
    %14 = vector.shape_cast %13 : vector<128xf32> to vector<128x1xf32>
    %cst_5 = arith.constant 3.125000e-02 : f32
    %15 = vector.broadcast %cst_5 : f32 to vector<128x1xf32>
    %16 = arith.mulf %14, %15 : vector<128x1xf32>
    %17 = vector.broadcast %16 : vector<128x1xf32> to vector<128x128xf32>
    %18 = arith.subf %7, %17 : vector<128x128xf32>
    %cst_6 = arith.constant 0.000000e+00 : f32
    %19 = vector.broadcast %cst_6 : f32 to vector<128x128xf32>
    %20 = arith.select %12, %18, %19 : vector<128x128xi1>, vector<128x128xf32>
    %21 = arith.mulf %20, %20 : vector<128x128xf32>
    %cst_7 = arith.constant dense<0.000000e+00> : vector<128xf32>
    %22 = vector.multi_reduction <add>, %21, %cst_7 [1] : vector<128x128xf32> to vector<128xf32>
    %23 = vector.shape_cast %22 : vector<128xf32> to vector<128x1xf32>
    %cst_8 = arith.constant 3.125000e-02 : f32
    %24 = vector.broadcast %cst_8 : f32 to vector<128x1xf32>
    %25 = arith.mulf %23, %24 : vector<128x1xf32>
    %26 = vector.broadcast %16 : vector<128x1xf32> to vector<128x128xf32>
    %27 = arith.subf %7, %26 : vector<128x128xf32>
    %cst_9 = arith.constant 9.99999974E-6 : f32
    %28 = vector.broadcast %cst_9 : f32 to vector<128x1xf32>
    %29 = arith.addf %25, %28 : vector<128x1xf32>
    %30 = math.rsqrt %29 : vector<128x1xf32>
    %31 = vector.broadcast %30 : vector<128x1xf32> to vector<128x128xf32>
    %32 = arith.mulf %27, %31 : vector<128x128xf32>
    %33 = vector.broadcast %8 : vector<1x128xf32> to vector<128x128xf32>
    %34 = arith.mulf %32, %33 : vector<128x128xf32>
    %35 = vector.broadcast %9 : vector<1x128xf32> to vector<128x128xf32>
    %36 = arith.addf %34, %35 : vector<128x128xf32>
    %c0_10 = arith.constant 0 : index
    %c0_11 = arith.constant 0 : index
    %37 = vector.load %arg6[%c0_10, %c0_11] : memref<128x128xf32, #tpu.memory_space<vmem>>, vector<128x128xf32>
    %cst_12 = arith.constant dense<0.000000e+00> : vector<128x128xf32>
    %38 = tpu.matmul %36, %37, %cst_12 {dimension_numbers = #tpu.dot_dimension_numbers<[1], [0], [0], [1], [0, 0, 1, 1], [], []>} : vector<128x128xf32>, vector<128x128xf32>, vector<128x128xf32> -> vector<128x128xf32>
    %39 = arith.truncf %38 : vector<128x128xf32> to vector<128x128xbf16>
    %c0_13 = arith.constant 0 : index
    %c0_14 = arith.constant 0 : index
    %40 = vector.load %arg12[%c0_13, %c0_14] : memref<128x128xf32, #tpu.memory_space<vmem>>, vector<128x128xf32>
    %c0_15 = arith.constant 0 : index
    %c0_16 = arith.constant 0 : index
    %41 = vector.load %arg2[%c0_15, %c0_16] : memref<128x128xbf16, #tpu.memory_space<vmem>>, vector<128x128xbf16>
    %cst_17 = arith.constant dense<0.000000e+00> : vector<128x128xf32>
    %42 = tpu.matmul %41, %39, %cst_17 {dimension_numbers = #tpu.dot_dimension_numbers<[1], [0], [0], [1], [0, 0, 1, 1], [], []>} : vector<128x128xbf16>, vector<128x128xbf16>, vector<128x128xf32> -> vector<128x128xf32>
    %43 = arith.addf %40, %42 : vector<128x128xf32>
    %c0_18 = arith.constant 0 : index
    %c0_19 = arith.constant 0 : index
    %44 = vector.load %arg12[%c0_18, %c0_19] : memref<128x128xf32, #tpu.memory_space<vmem>>, vector<128x128xf32>
    tpu.vector_store %arg12[%c0_18, %c0_19], %43 {strides = array<i32>} : memref<128x128xf32, #tpu.memory_space<vmem>>, vector<128x128xf32>,
    %c0_i32_20 = arith.constant 0 : i32
    %45 = arith.cmpi eq, %arg1, %c0_i32_20 : i32
    %46 = arith.extui %45 : i1 to i32
    %c0_i32_21 = arith.constant 0 : i32
    %47 = arith.cmpi ne, %46, %c0_i32_21 : i32
    scf.if %47 {
      %c0_22 = arith.constant 0 : index
      %c0_23 = arith.constant 0 : index
      %48 = vector.load %arg12[%c0_22, %c0_23] : memref<128x128xf32, #tpu.memory_space<vmem>>, vector<128x128xf32>
      %c0_24 = arith.constant 0 : index
      %c0_25 = arith.constant 0 : index
      %49 = vector.load %arg7[%c0_24, %c0_25] : memref<1x128xf32, #tpu.memory_space<vmem>>, vector<1x128xf32>
      %50 = vector.broadcast %49 : vector<1x128xf32> to vector<128x128xf32>
      %51 = arith.addf %48, %50 : vector<128x128xf32>
      %cst_26 = arith.constant 0.000000e+00 : f32
      %52 = vector.broadcast %cst_26 : f32 to vector<128x128xf32>
      %53 = arith.maximumf %51, %52 : vector<128x128xf32>
      %c0_27 = arith.constant 0 : index
      %c0_28 = arith.constant 0 : index
      %54 = vector.load %arg8[%c0_27, %c0_28] : memref<1x128xf32, #tpu.memory_space<vmem>>, vector<1x128xf32>
      %c0_29 = arith.constant 0 : index
      %c0_30 = arith.constant 0 : index
      %55 = vector.load %arg9[%c0_29, %c0_30] : memref<1x128xf32, #tpu.memory_space<vmem>>, vector<1x128xf32>
      %56 = tpu.iota {dimensions = array<i32: 1>} : vector<128x128xi32>
      %c16_i32 = arith.constant 16 : i32
      %57 = vector.broadcast %c16_i32 : i32 to vector<128x128xi32>
      %58 = arith.cmpi slt, %56, %57 : vector<128x128xi32>
      %cst_31 = arith.constant dense<0.000000e+00> : vector<128xf32>
      %59 = vector.multi_reduction <add>, %53, %cst_31 [1] : vector<128x128xf32> to vector<128xf32>
      %60 = vector.shape_cast %59 : vector<128xf32> to vector<128x1xf32>
      %cst_32 = arith.constant 6.250000e-02 : f32
      %61 = vector.broadcast %cst_32 : f32 to vector<128x1xf32>
      %62 = arith.mulf %60, %61 : vector<128x1xf32>
      %63 = vector.broadcast %62 : vector<128x1xf32> to vector<128x128xf32>
      %64 = arith.subf %53, %63 : vector<128x128xf32>
      %cst_33 = arith.constant 0.000000e+00 : f32
      %65 = vector.broadcast %cst_33 : f32 to vector<128x128xf32>
      %66 = arith.select %58, %64, %65 : vector<128x128xi1>, vector<128x128xf32>
      %67 = arith.mulf %66, %66 : vector<128x128xf32>
      %cst_34 = arith.constant dense<0.000000e+00> : vector<128xf32>
      %68 = vector.multi_reduction <add>, %67, %cst_34 [1] : vector<128x128xf32> to vector<128xf32>
      %69 = vector.shape_cast %68 : vector<128xf32> to vector<128x1xf32>
      %cst_35 = arith.constant 6.250000e-02 : f32
      %70 = vector.broadcast %cst_35 : f32 to vector<128x1xf32>
      %71 = arith.mulf %69, %70 : vector<128x1xf32>
      %72 = vector.broadcast %62 : vector<128x1xf32> to vector<128x128xf32>
      %73 = arith.subf %53, %72 : vector<128x128xf32>
      %cst_36 = arith.constant 9.99999974E-6 : f32
      %74 = vector.broadcast %cst_36 : f32 to vector<128x1xf32>
      %75 = arith.addf %71, %74 : vector<128x1xf32>
      %76 = math.rsqrt %75 : vector<128x1xf32>
      %77 = vector.broadcast %76 : vector<128x1xf32> to vector<128x128xf32>
      %78 = arith.mulf %73, %77 : vector<128x128xf32>
      %79 = vector.broadcast %54 : vector<1x128xf32> to vector<128x128xf32>
      %80 = arith.mulf %78, %79 : vector<128x128xf32>
      %81 = vector.broadcast %55 : vector<1x128xf32> to vector<128x128xf32>
      %82 = arith.addf %80, %81 : vector<128x128xf32>
      %c0_37 = arith.constant 0 : index
      %c0_38 = arith.constant 0 : index
      %83 = vector.load %arg10[%c0_37, %c0_38] : memref<128x128xf32, #tpu.memory_space<vmem>>, vector<128x128xf32>
      %cst_39 = arith.constant dense<0.000000e+00> : vector<128x128xf32>
      %84 = tpu.matmul %82, %83, %cst_39 {dimension_numbers = #tpu.dot_dimension_numbers<[1], [0], [0], [1], [0, 0, 1, 1], [], []>} : vector<128x128xf32>, vector<128x128xf32>, vector<128x128xf32> -> vector<128x128xf32>
      %85 = arith.truncf %84 : vector<128x128xf32> to vector<128x128xbf16>
      %c0_40 = arith.constant 0 : index
      %c0_41 = arith.constant 0 : index
      %86 = vector.load %arg11[%c0_40, %c0_41] : memref<128x128xbf16, #tpu.memory_space<vmem>>, vector<128x128xbf16>
      tpu.vector_store %arg11[%c0_40, %c0_41], %85 {strides = array<i32>} : memref<128x128xbf16, #tpu.memory_space<vmem>>, vector<128x128xbf16>,
    } else {
    }
    return
  }
  func.func @transform_0(%arg0: i32, %arg1: i32) -> (i32, i32) {
    %c0_i32 = arith.constant 0 : i32
    return %arg0, %arg1 : i32, i32
  }
  func.func @transform_1(%arg0: i32, %arg1: i32) -> (i32, i32) {
    %c0_i32 = arith.constant 0 : i32
    %c0_i32_0 = arith.constant 0 : i32
    %c0_i32_1 = arith.constant 0 : i32
    return %c0_i32, %c0_i32_0 : i32, i32
  }
  func.func @transform_2(%arg0: i32, %arg1: i32) -> (i32, i32) {
    %c0_i32 = arith.constant 0 : i32
    %c0_i32_0 = arith.constant 0 : i32
    %c0_i32_1 = arith.constant 0 : i32
    return %c0_i32, %c0_i32_0 : i32, i32
  }
  func.func @transform_3(%arg0: i32, %arg1: i32) -> (i32, i32) {
    %c0_i32 = arith.constant 0 : i32
    %c0_i32_0 = arith.constant 0 : i32
    %c0_i32_1 = arith.constant 0 : i32
    return %c0_i32, %c0_i32_0 : i32, i32
  }
  func.func @transform_4(%arg0: i32, %arg1: i32) -> (i32, i32) {
    %c0_i32 = arith.constant 0 : i32
    %c0_i32_0 = arith.constant 0 : i32
    %c0_i32_1 = arith.constant 0 : i32
    return %c0_i32, %c0_i32_0 : i32, i32
  }
  func.func @transform_5(%arg0: i32, %arg1: i32) -> (i32, i32) {
    %c0_i32 = arith.constant 0 : i32
    %c0_i32_0 = arith.constant 0 : i32
    %c0_i32_1 = arith.constant 0 : i32
    return %c0_i32, %c0_i32_0 : i32, i32
  }
  func.func @transform_6(%arg0: i32, %arg1: i32) -> (i32, i32) {
    %c0_i32 = arith.constant 0 : i32
    %c0_i32_0 = arith.constant 0 : i32
    %c0_i32_1 = arith.constant 0 : i32
    return %c0_i32, %c0_i32_0 : i32, i32
  }
  func.func @transform_7(%arg0: i32, %arg1: i32) -> (i32, i32) {
    %c0_i32 = arith.constant 0 : i32
    %c0_i32_0 = arith.constant 0 : i32
    %c0_i32_1 = arith.constant 0 : i32
    return %c0_i32, %c0_i32_0 : i32, i32
  }
  func.func @transform_8(%arg0: i32, %arg1: i32) -> (i32, i32) {
    %c0_i32 = arith.constant 0 : i32
    %c0_i32_0 = arith.constant 0 : i32
    %c0_i32_1 = arith.constant 0 : i32
    return %c0_i32, %c0_i32_0 : i32, i32
  }
  func.func @transform_9(%arg0: i32, %arg1: i32) -> (i32, i32) {
    %c0_i32 = arith.constant 0 : i32
    %c0_i32_0 = arith.constant 0 : i32
    return %arg0, %c0_i32 : i32, i32
  }
}

</mosaic_0001>

<bundles_post_ra>
// kernel: tpu_custom_call.1
= control target key start
LH: loop header
LB: loop body
LE: loop exit
PB: predicated region body
PF: predicated region fallthrough
CT: control target
= control target key end

     0   :  { %14 = vsyncpa [#allocation4], 0  ;;  %s2568_s0 = inlined_call_operand.hbm [shape: bf16[128,128], index: 0, kind: input, shape index: {}]   ;;  %s2569_s1 = inlined_call_operand.hbm [shape: bf16[128,128], index: 1, kind: input, shape index: {}]   ;;  %s2570_s2 = inlined_call_operand.vmem [shape: f32[1,128], index: 2, kind: input, shape index: {}]   ;;  %s2571_s3 = inlined_call_operand.vmem [shape: f32[1,128], index: 3, kind: input, shape index: {}]   ;;  %s2572_s4 = inlined_call_operand.hbm [shape: f32[128,128], index: 4, kind: input, shape index: {}]   ;;  %s2573_s5 = inlined_call_operand.vmem [shape: f32[1,128], index: 5, kind: input, shape index: {}]   ;;  %s2574_s6 = inlined_call_operand.vmem [shape: f32[1,128], index: 6, kind: input, shape index: {}]   ;;  %s2575_s7 = inlined_call_operand.vmem [shape: f32[1,128], index: 7, kind: input, shape index: {}]   ;;  %s2576_s8 = inlined_call_operand.hbm [shape: f32[128,128], index: 8, kind: input, shape index: {}]   ;;  %s2577_s9 = inlined_call_operand.hbm [shape: bf16[128,128], index: 9, kind: output, shape index: {}]  }
   0x1   :  { %15 = vsyncpa [#allocation7], 0 }
   0x2   :  { %16 = vsyncpa [#allocation10], 0 }
   0x3   :  { %17 = vsyncpa [#allocation5], 0  ;;  %s1958_s30 = smov [#allocation6]   ;;  %s1959_s11 = smov [#allocation3]  }
   0x4   :  { %s35_s10 = sshll.u32 %s1958_s30, 4  ;;  %s23_s12 = sshll.u32 %s1959_s11, 4  ;;  %s36_s10 = int_to_ptr.vmem [resolvable:$true] %s35_s10  ;;  %s2017_s12 = int_to_ptr.vmem [resolvable:$true] %s23_s12 }
   0x5   :  { %s1840_s15 = scalar_lea.hbm %s2569_s1, 1024 }
   0x6   :  { %p1841_p0 = scmp.ne.s32.totalorder %s2569_s1, %s1840_s15  ;;  %p1844_p1 = scmp.lt.u32.totalorder %s1840_s15, %s2569_s1 }
   0x8   :  { %p1846_p2 = pnand %p1844_p1, %p1841_p0 }
   0xa   :  { %1849 = shalt.err (!%p1846_p2)
}
   0xb   :  { %s1850_s20 = scalar_lea.vmem %s36_s10, 1024  ;;  %p1855_p4 = scmp.lt.s32.totalorder %s36_s10, %s36_s10 }
   0xc   :  { %p1851_p3 = scmp.ne.s32.totalorder %s36_s10, %s1850_s20  ;;  %p1856_p5 = scmp.lt.s32.totalorder %s1850_s20, %s1850_s20 }
   0xe   :  { %p1857_p6 = por %p1856_p5, %p1855_p4 }
  0x10   :  { %p1858_p7 = pnand %p1857_p6, %p1851_p3 }
  0x12   :  { %1861 = shalt.err (!%p1858_p7)
}
  0x13   :  { %s1960_s21 = smov 64   ;;  %s1961_s22 = smov 4  }
  0x14   :  { %41 = dma.hbm_to_vmem [thread:$0]  %s2569_s1, 1024, %s36_s10, [#allocation7], %s1960_s21, %s1960_s21, %s1961_s22  }
  0x15   :  { %s1862_s27 = scalar_lea.hbm %s2568_s0, 1024 }
  0x16   :  { %p1863_p8 = scmp.ne.s32.totalorder %s2568_s0, %s1862_s27  ;;  %p1866_p9 = scmp.lt.u32.totalorder %s1862_s27, %s2568_s0 }
  0x18   :  { %p1868_p10 = pnand %p1866_p9, %p1863_p8 }
  0x1a   :  { %1871 = shalt.err (!%p1868_p10)
}
  0x1b   :  { %s1872_s13 = scalar_lea.vmem %s2017_s12, 1024  ;;  %p1877_p12 = scmp.lt.s32.totalorder %s2017_s12, %s2017_s12 }
  0x1c   :  { %p1873_p11 = scmp.ne.s32.totalorder %s2017_s12, %s1872_s13  ;;  %p1878_p13 = scmp.lt.s32.totalorder %s1872_s13, %s1872_s13 }
  0x1e   :  { %p1879_p0 = por %p1878_p13, %p1877_p12 }
  0x20   :  { %p1880_p1 = pnand %p1879_p0, %p1873_p11 }
  0x22   :  { %1883 = shalt.err (!%p1880_p1)
}
  0x23   :  { %29 = dma.hbm_to_vmem [thread:$0]  %s2568_s0, 1024, %s2017_s12, [#allocation4], %s1960_s21, %s1960_s21, %s1961_s22  }
  0x24   :  { %s1962_s14 = smov [#allocation8]   ;;  %s1884_s18 = scalar_lea.hbm %s2572_s4, 2048 }
  0x25   :  { %s51_s15 = sshll.u32 %s1962_s14, 4  ;;  %p1885_p2 = scmp.ne.s32.totalorder %s2572_s4, %s1884_s18  ;;  %s52_s15 = int_to_ptr.vmem [resolvable:$true] %s51_s15 }
  0x26   :  { %p1888_p3 = scmp.lt.u32.totalorder %s1884_s18, %s2572_s4 }
  0x28   :  { %p1890_p4 = pnand %p1888_p3, %p1885_p2 }
  0x2a   :  { %1893 = shalt.err (!%p1890_p4)
}
  0x2b   :  { %s1894_s25 = scalar_lea.vmem %s52_s15, 2048  ;;  %p1899_p6 = scmp.lt.s32.totalorder %s52_s15, %s52_s15 }
  0x2c   :  { %p1895_p5 = scmp.ne.s32.totalorder %s52_s15, %s1894_s25  ;;  %p1900_p7 = scmp.lt.s32.totalorder %s1894_s25, %s1894_s25 }
  0x2e   :  { %p1901_p8 = por %p1900_p7, %p1899_p6 }
  0x30   :  { %p1902_p9 = pnand %p1901_p8, %p1895_p5 }
  0x32   :  { %1905 = shalt.err (!%p1902_p9)
}
  0x33   :  { %s1963_s0 = smov 128   ;;  %s1964_s12 = smov 8  }
  0x34   :  { %57 = dma.hbm_to_vmem [thread:$0]  %s2572_s4, 2048, %s52_s15, [#allocation7], %s1963_s0, %s1963_s0, %s1964_s12  }
  0x35   :  { %s1965_s28 = smov [#allocation9]   ;;  %s1906_s13 = scalar_lea.hbm %s2576_s8, 2048 }
  0x36   :  { %s69_s29 = sshll.u32 %s1965_s28, 4  ;;  %p1907_p10 = scmp.ne.s32.totalorder %s2576_s8, %s1906_s13  ;;  %s70_s29 = int_to_ptr.vmem [resolvable:$true] %s69_s29 }
  0x37   :  { %p1910_p11 = scmp.lt.u32.totalorder %s1906_s13, %s2576_s8 }
  0x39   :  { %p1912_p12 = pnand %p1910_p11, %p1907_p10 }
  0x3b   :  { %1915 = shalt.err (!%p1912_p12)
}
  0x3c   :  { %s1916_s17 = scalar_lea.vmem %s70_s29, 2048  ;;  %p1921_p0 = scmp.lt.s32.totalorder %s70_s29, %s70_s29 }
  0x3d   :  { %p1917_p13 = scmp.ne.s32.totalorder %s70_s29, %s1916_s17  ;;  %p1922_p1 = scmp.lt.s32.totalorder %s1916_s17, %s1916_s17 }
  0x3f   :  { %p1923_p2 = por %p1922_p1, %p1921_p0 }
  0x41   :  { %p1924_p3 = pnand %p1923_p2, %p1917_p13 }
  0x43   :  { %1927 = shalt.err (!%p1924_p3)
}
  0x44   :  { %75 = dma.hbm_to_vmem [thread:$0]  %s2576_s8, 2048, %s70_s29, [#allocation10], %s1963_s0, %s1963_s0, %s1964_s12  }
  0x45   :  { %1950 = dma.done.wait [#allocation4], 1024  }
  0x46   :  { %1951 = vsyncadd [#allocation4], 4294966272 }
  0x47   :  { %1952 = dma.done.wait [#allocation7], 3072  }
  0x48   :  { %1953 = vsyncadd [#allocation7], 4294964224 }
  0x49   :  { %1954 = dma.done.wait [#allocation10], 2048  }
  0x4a   :  { %1955 = vsyncadd [#allocation10], 4294965248  ;;  %v2078_v0 = vld [vmem:[#allocation6] sm:$0xff]   ;;  %v2080_v1 = vld [vmem:[#allocation6 + $0x8] sm:$0xff]   ;;  %v148_v30 = vlaneseq }
  0x4b   :  { %v1371_v2 = vunpack.c.l.bf16 %v2078_v0  ;;  %v1375_v3 = vunpack.c.l.bf16 %v2080_v1  ;;  %v2084_v4 = vld [vmem:[#allocation6 + $0x10] sm:$0xff]   ;;  %v1372_v5 = vunpack.c.h.bf16 %v2078_v0  ;;  %v1376_v6 = vunpack.c.h.bf16 %v2080_v1  ;;  %v2090_v9 = vld [vmem:[#allocation6 + $0x18] sm:$0xff]   ;;  %v2098_v12 = vld [vmem:[#allocation6 + $0x20] sm:$0xff]  }
  0x4c   :  { %v1379_v7 = vunpack.c.l.bf16 %v2084_v4  ;;  %v1380_v8 = vunpack.c.h.bf16 %v2084_v4  ;;  %v1383_v10 = vunpack.c.l.bf16 %v2090_v9  ;;  %v1384_v11 = vunpack.c.h.bf16 %v2090_v9  ;;  %v2106_v15 = vld [vmem:[#allocation6 + $0x28] sm:$0xff]   ;;  %v2114_v18 = vld [vmem:[#allocation6 + $0x30] sm:$0xff]   ;;  %v2122_v21 = vld [vmem:[#allocation6 + $0x38] sm:$0xff]  }
  0x4d   :  { %151 = vadd.xlane.f32.xlu0 %v1371_v2  ;;  %155 = vadd.xlane.f32.xlu1 %v1375_v3  ;;  %v1387_v13 = vunpack.c.l.bf16 %v2098_v12  ;;  %v1388_v14 = vunpack.c.h.bf16 %v2098_v12  ;;  %v1391_v16 = vunpack.c.l.bf16 %v2106_v15  ;;  %v1392_v17 = vunpack.c.h.bf16 %v2106_v15  ;;  %v387_v24 = vld [vmem:[#allocation8] sm:$0xff]  ;;  %v388_v25 = vld [vmem:[#allocation8 + $0x8] sm:$0xff]  ;;  %v389_v26 = vld [vmem:[#allocation8 + $0x10] sm:$0xff] }
  0x4e   :  { %v1395_v19 = vunpack.c.l.bf16 %v2114_v18  ;;  %v1396_v20 = vunpack.c.h.bf16 %v2114_v18  ;;  %v1399_v22 = vunpack.c.l.bf16 %v2122_v21  ;;  %v1400_v23 = vunpack.c.h.bf16 %v2122_v21  ;;  %v390_v28 = vld [vmem:[#allocation8 + $0x18] sm:$0xff]  ;;  %v396_v18 = vld [vmem:[#allocation8 + $0x48] sm:$0xff] }
  0x4f   :  { %v1679_v27 = vpack.c.bf16 %v388_v25, %v387_v24  ;;  %v1683_v29 = vpack.c.bf16 %v390_v28, %v389_v26  ;;  %v2134_v31 = vand.u32 127, %v148_v30  ;;  %v391_v28 = vld [vmem:[#allocation8 + $0x20] sm:$0xff]  ;;  %v394_v15 = vld [vmem:[#allocation8 + $0x38] sm:$0xff] }
  0x51   :  { %153 = vadd.xlane.f32.xlu0 %v1372_v5  ;;  %157 = vadd.xlane.f32.xlu1 %v1376_v6  ;;  %vm150_vm0 = vcmp.lt.s32.totalorder %v2134_v31, 32  ;;  %vm825_vm1 = vcmp.lt.s32.totalorder %v2134_v31, 16 }
  0x52   :  { %1680 = vmatprep.subr.bf16.mxu0 %v1679_v27 }
  0x53   :  { %1682 = vmatpush3.bf16.msra.mxu0 %v1679_v27 }
  0x54   :  { %1684 = vmatprep.subr.bf16.mxu0 %v1683_v29 }
  0x55   :  { %159 = vadd.xlane.f32.xlu0 %v1379_v7  ;;  %161 = vadd.xlane.f32.xlu1 %v1380_v8 }
  0x57   :  { %1686 = vmatpush3.bf16.msra.mxu0 %v1683_v29  ;;  %v392_v29 = vld [vmem:[#allocation8 + $0x28] sm:$0xff] }
  0x59   :  { %163 = vadd.xlane.f32.xlu0 %v1383_v10  ;;  %165 = vadd.xlane.f32.xlu1 %v1384_v11 }
  0x5d   :  { %167 = vadd.xlane.f32.xlu0 %v1387_v13  ;;  %169 = vadd.xlane.f32.xlu1 %v1388_v14 }
  0x61   :  { %171 = vadd.xlane.f32.xlu0 %v1391_v16  ;;  %173 = vadd.xlane.f32.xlu1 %v1392_v17 }
  0x65   :  { %175 = vadd.xlane.f32.xlu0 %v1395_v19  ;;  %177 = vadd.xlane.f32.xlu1 %v1396_v20 }
  0x69   :  { %179 = vadd.xlane.f32.xlu0 %v1399_v22  ;;  %181 = vadd.xlane.f32.xlu1 %v1400_v23 }
  0xda   :  { %v152_v32 = vpop.xlane.xlu0 %151  ;;  %v156_v33 = vpop.xlane.xlu1 %155 }
  0xdb   :  { %v183_v34 = vmul.f32 0.03125, %v152_v32  ;;  %v185_v35 = vmul.f32 0.03125, %v156_v33 }
  0xdd   :  { %v2137_v36 = vsub.f32 %v1371_v2, %v183_v34  ;;  %v2139_v37 = vsub.f32 %v1375_v3, %v185_v35 }
  0xde   :  { %v154_v38 = vpop.xlane.xlu0 %153  ;;  %v158_v39 = vpop.xlane.xlu1 %157 }
  0xdf   :  { %v184_v40 = vmul.f32 0.03125, %v154_v38  ;;  %v186_v41 = vmul.f32 0.03125, %v158_v39  ;;  %v215_v42 = vsel %vm150_vm0, %v2137_v36, 0.0  ;;  %v217_v43 = vsel %vm150_vm0, %v2139_v37, 0.0 }
  0xe0   :  { %v231_v44 = vmul.f32 %v215_v42, %v215_v42  ;;  %v233_v49 = vmul.f32 %v217_v43, %v217_v43 }
  0xe1   :  { %v2147_v45 = vsub.f32 %v1372_v5, %v184_v40  ;;  %v2149_v46 = vsub.f32 %v1376_v6, %v186_v41 }
  0xe2   :  { %247 = vadd.xlane.f32.xlu0 %v231_v44  ;;  %v160_v47 = vpop.xlane.xlu0 %159  ;;  %v162_v48 = vpop.xlane.xlu1 %161  ;;  %v393_v44 = vld [vmem:[#allocation8 + $0x30] sm:$0xff] }
  0xe3   :  { %v187_v50 = vmul.f32 0.03125, %v160_v47  ;;  %v188_v51 = vmul.f32 0.03125, %v162_v48  ;;  %v216_v52 = vsel %vm150_vm0, %v2147_v45, 0.0  ;;  %v218_v53 = vsel %vm150_vm0, %v2149_v46, 0.0 }
  0xe4   :  { %v232_v54 = vmul.f32 %v216_v52, %v216_v52  ;;  %v234_v59 = vmul.f32 %v218_v53, %v218_v53  ;;  %v1691_v47 = vpack.c.bf16 %v394_v15, %v393_v44 }
  0xe5   :  { %v2159_v55 = vsub.f32 %v1379_v7, %v187_v50  ;;  %v2163_v56 = vsub.f32 %v1380_v8, %v188_v51 }
  0xe6   :  { %251 = vadd.xlane.f32.xlu0 %v233_v49  ;;  %249 = vadd.xlane.f32.xlu1 %v232_v54  ;;  %v164_v57 = vpop.xlane.xlu0 %163  ;;  %v166_v58 = vpop.xlane.xlu1 %165 }
  0xe7   :  { %v189_v60 = vmul.f32 0.03125, %v164_v57  ;;  %v190_v61 = vmul.f32 0.03125, %v166_v58  ;;  %v219_v62 = vsel %vm150_vm0, %v2159_v55, 0.0  ;;  %v220_v63 = vsel %vm150_vm0, %v2163_v56, 0.0  ;;  %v395_v58 = vld [vmem:[#allocation8 + $0x40] sm:$0xff] }
  0xe8   :  { %v235_v0 = vmul.f32 %v219_v62, %v219_v62  ;;  %v236_v5 = vmul.f32 %v220_v63, %v220_v63 }
  0xe9   :  { %v2173_v1 = vsub.f32 %v1383_v10, %v189_v60  ;;  %v2177_v2 = vsub.f32 %v1384_v11, %v190_v61 }
  0xea   :  { %253 = vadd.xlane.f32.xlu1 %v234_v59  ;;  %255 = vadd.xlane.f32.xlu0 %v235_v0  ;;  %v168_v3 = vpop.xlane.xlu0 %167  ;;  %v170_v4 = vpop.xlane.xlu1 %169  ;;  %v1695_v59 = vpack.c.bf16 %v396_v18, %v395_v58 }
  0xeb   :  { %v191_v6 = vmul.f32 0.03125, %v168_v3  ;;  %v192_v7 = vmul.f32 0.03125, %v170_v4  ;;  %v221_v8 = vsel %vm150_vm0, %v2173_v1, 0.0  ;;  %v222_v10 = vsel %vm150_vm0, %v2177_v2, 0.0  ;;  %v397_v3 = vld [vmem:[#allocation8 + $0x50] sm:$0xff]  ;;  %v398_v4 = vld [vmem:[#allocation8 + $0x58] sm:$0xff] }
  0xec   :  { %v237_v24 = vmul.f32 %v221_v8, %v221_v8  ;;  %v238_v27 = vmul.f32 %v222_v10, %v222_v10  ;;  %v401_v8 = vld [vmem:[#allocation8 + $0x70] sm:$0xff]  ;;  %v402_v10 = vld [vmem:[#allocation8 + $0x78] sm:$0xff] }
  0xed   :  { %v2187_v9 = vsub.f32 %v1387_v13, %v191_v6  ;;  %v2191_v11 = vsub.f32 %v1388_v14, %v192_v7  ;;  %v1687_v14 = vpack.c.bf16 %v392_v29, %v391_v28  ;;  %v400_v6 = vld [vmem:[#allocation8 + $0x68] sm:$0xff] }
  0xee   :  { %257 = vadd.xlane.f32.xlu1 %v236_v5  ;;  %259 = vadd.xlane.f32.xlu0 %v237_v24  ;;  %v172_v25 = vpop.xlane.xlu0 %171  ;;  %v174_v26 = vpop.xlane.xlu1 %173  ;;  %v1699_v5 = vpack.c.bf16 %v398_v4, %v397_v3  ;;  %v1707_v24 = vpack.c.bf16 %v402_v10, %v401_v8 }
  0xef   :  { %v193_v30 = vmul.f32 0.03125, %v172_v25  ;;  %v194_v32 = vmul.f32 0.03125, %v174_v26  ;;  %v223_v33 = vsel %vm150_vm0, %v2187_v9, 0.0  ;;  %v224_v13 = vsel %vm150_vm0, %v2191_v11, 0.0  ;;  %1688 = vmatprep.subr.bf16.mxu0 %v1687_v14 }
  0xf0   :  { %v239_v12 = vmul.f32 %v223_v33, %v223_v33  ;;  %v240_v40 = vmul.f32 %v224_v13, %v224_v13  ;;  %1690 = vmatpush3.bf16.msra.mxu0 %v1687_v14 }
  0xf1   :  { %v2201_v34 = vsub.f32 %v1391_v16, %v193_v30  ;;  %v2205_v35 = vsub.f32 %v1392_v17, %v194_v32  ;;  %1692 = vmatprep.subr.bf16.mxu0 %v1691_v47 }
  0xf2   :  { %261 = vadd.xlane.f32.xlu1 %v238_v27  ;;  %263 = vadd.xlane.f32.xlu0 %v239_v12  ;;  %v176_v38 = vpop.xlane.xlu0 %175  ;;  %v178_v39 = vpop.xlane.xlu1 %177 }
  0xf3   :  { %v195_v41 = vmul.f32 0.03125, %v176_v38  ;;  %v196_v42 = vmul.f32 0.03125, %v178_v39  ;;  %v225_v43 = vsel %vm150_vm0, %v2201_v34, 0.0  ;;  %v226_v16 = vsel %vm150_vm0, %v2205_v35, 0.0 }
  0xf4   :  { %v241_v17 = vmul.f32 %v225_v43, %v225_v43  ;;  %v242_v52 = vmul.f32 %v226_v16, %v226_v16  ;;  %1694 = vmatpush3.bf16.msra.mxu0 %v1691_v47 }
  0xf5   :  { %v2215_v48 = vsub.f32 %v1395_v19, %v195_v41  ;;  %v2219_v49 = vsub.f32 %v1396_v20, %v196_v42  ;;  %1696 = vmatprep.subr.bf16.mxu0 %v1695_v59 }
  0xf6   :  { %265 = vadd.xlane.f32.xlu1 %v240_v40  ;;  %267 = vadd.xlane.f32.xlu0 %v241_v17  ;;  %v180_v50 = vpop.xlane.xlu0 %179  ;;  %v182_v51 = vpop.xlane.xlu1 %181 }
  0xf7   :  { %v197_v53 = vmul.f32 0.03125, %v180_v50  ;;  %v198_v54 = vmul.f32 0.03125, %v182_v51  ;;  %v227_v57 = vsel %vm150_vm0, %v2215_v48, 0.0  ;;  %v228_v19 = vsel %vm150_vm0, %v2219_v49, 0.0  ;;  %v2244_v50 = vld [vmem:[%s2570_s2] ss:$0 sm:$0xff] }
  0xf8   :  { %v243_v20 = vmul.f32 %v227_v57, %v227_v57  ;;  %v244_v62 = vmul.f32 %v228_v19, %v228_v19  ;;  %1698 = vmatpush3.bf16.msra.mxu0 %v1695_v59  ;;  %v2250_v19 = vld [vmem:[%s2571_s3] ss:$0 sm:$0xff] }
  0xf9   :  { %v2229_v60 = vsub.f32 %v1399_v22, %v197_v53  ;;  %v2233_v61 = vsub.f32 %v1400_v23, %v198_v54  ;;  %1700 = vmatprep.subr.bf16.mxu0 %v1699_v5  ;;  %v399_v23 = vld [vmem:[#allocation8 + $0x60] sm:$0xff] }
  0xfa   :  { %269 = vadd.xlane.f32.xlu1 %v242_v52  ;;  %271 = vadd.xlane.f32.xlu0 %v243_v20  ;;  %v1703_v7 = vpack.c.bf16 %v400_v6, %v399_v23 }
  0xfb   :  { %v229_v63 = vsel %vm150_vm0, %v2229_v60, 0.0  ;;  %v230_v0 = vsel %vm150_vm0, %v2233_v61, 0.0 }
  0xfc   :  { %v245_v22 = vmul.f32 %v229_v63, %v229_v63  ;;  %v246_v21 = vmul.f32 %v230_v0, %v230_v0  ;;  %1702 = vmatpush3.bf16.msra.mxu0 %v1699_v5 }
  0xfd   :  { %1704 = vmatprep.subr.bf16.mxu0 %v1703_v7 }
  0xfe   :  { %273 = vadd.xlane.f32.xlu1 %v244_v62  ;;  %275 = vadd.xlane.f32.xlu0 %v245_v22 }
 0x100   :  { %1706 = vmatpush3.bf16.msra.mxu0 %v1703_v7 }
 0x101   :  { %1708 = vmatprep.subr.bf16.mxu0 %v1707_v24 }
 0x102   :  { %277 = vadd.xlane.f32.xlu1 %v246_v21 }
 0x104   :  { %1710 = vmatpush3.bf16.msra.mxu0 %v1707_v24 }
 0x16f   :  { %v248_v25 = vpop.xlane.xlu0 %247 }
 0x170   :  { %v279_v26 = vmul.f32 0.03125, %v248_v25 }
 0x172   :  { %v295_v27 = vadd.f32 1e-05, %v279_v26 }
 0x173   :  { %v250_v28 = vpop.xlane.xlu1 %249  ;;  %v252_v29 = vpop.xlane.xlu0 %251 }
 0x174   :  { %1776 = vrsqrt.f32 %v295_v27  ;;  %v280_v30 = vmul.f32 0.03125, %v250_v28  ;;  %v281_v32 = vmul.f32 0.03125, %v252_v29 }
 0x176   :  { %v296_v33 = vadd.f32 1e-05, %v280_v30  ;;  %v297_v13 = vadd.f32 1e-05, %v281_v32 }
 0x177   :  { %v254_v12 = vpop.xlane.xlu1 %253  ;;  %v256_v14 = vpop.xlane.xlu0 %255 }
 0x178   :  { %1778 = vrsqrt.f32 %v296_v33  ;;  %v282_v38 = vmul.f32 0.03125, %v254_v12  ;;  %v283_v39 = vmul.f32 0.03125, %v256_v14 }
 0x179   :  { %1780 = vrsqrt.f32 %v297_v13 }
 0x17a   :  { %v298_v40 = vadd.f32 1e-05, %v282_v38  ;;  %v299_v41 = vadd.f32 1e-05, %v283_v39 }
 0x17b   :  { %v258_v42 = vpop.xlane.xlu1 %257  ;;  %v260_v43 = vpop.xlane.xlu0 %259 }
 0x17c   :  { %1782 = vrsqrt.f32 %v298_v40  ;;  %v284_v16 = vmul.f32 0.03125, %v258_v42  ;;  %v285_v44 = vmul.f32 0.03125, %v260_v43 }
 0x17d   :  { %1784 = vrsqrt.f32 %v299_v41 }
 0x17e   :  { %v1777_v15 = vpop.eup %1776  ;;  %v300_v17 = vadd.f32 1e-05, %v284_v16  ;;  %v301_v47 = vadd.f32 1e-05, %v285_v44 }
 0x17f   :  { %v262_v51 = vpop.xlane.xlu1 %261  ;;  %v264_v52 = vpop.xlane.xlu0 %263  ;;  %v327_v53 = vmul.f32 %v1777_v15, %v2137_v36 }
 0x180   :  { %1786 = vrsqrt.f32 %v300_v17  ;;  %v286_v54 = vmul.f32 0.03125, %v262_v51  ;;  %v287_v57 = vmul.f32 0.03125, %v264_v52 }
 0x181   :  { %1788 = vrsqrt.f32 %v301_v47  ;;  %v349_v58 = vmul.f32 %v2244_v50, %v327_v53 }
 0x182   :  { %v1779_v18 = vpop.eup %1778  ;;  %v302_v20 = vadd.f32 1e-05, %v286_v54  ;;  %v303_v59 = vadd.f32 1e-05, %v287_v57 }
 0x183   :  { %v1781_v62 = vpop.eup %1780  ;;  %v266_v63 = vpop.xlane.xlu1 %265  ;;  %v371_v3 = vadd.f32 %v2250_v19, %v349_v58  ;;  %v328_v36 = vmul.f32 %v1779_v18, %v2147_v45 }
 0x184   :  { %v268_v0 = vpop.xlane.xlu0 %267  ;;  %1790 = vrsqrt.f32 %v302_v20  ;;  %v288_v4 = vmul.f32 0.03125, %v266_v63  ;;  %v329_v5 = vmul.f32 %v1781_v62, %v2139_v37 }
 0x185   :  { %v289_v22 = vmul.f32 0.03125, %v268_v0  ;;  %1792 = vrsqrt.f32 %v303_v59  ;;  %1567 = vmatprep.mubr.f32.mxu0 %v371_v3  ;;  %v350_v21 = vmul.f32 %v2244_v50, %v328_v36 }
 0x186   :  { %v1783_v23 = vpop.eup %1782  ;;  %v304_v6 = vadd.f32 1e-05, %v288_v4  ;;  %v351_v8 = vmul.f32 %v2244_v50, %v329_v5 }
 0x187   :  { %v305_v7 = vadd.f32 1e-05, %v289_v22  ;;  %v1785_v10 = vpop.eup %1784  ;;  %v270_v24 = vpop.xlane.xlu1 %269  ;;  %v372_v26 = vadd.f32 %v2250_v19, %v350_v21  ;;  %v330_v45 = vmul.f32 %v1783_v23, %v2149_v46 }
 0x188   :  { %v272_v25 = vpop.xlane.xlu0 %271  ;;  %1794 = vrsqrt.f32 %v304_v6  ;;  %v290_v27 = vmul.f32 0.03125, %v270_v24  ;;  %v373_v37 = vadd.f32 %v2250_v19, %v351_v8  ;;  %v331_v30 = vmul.f32 %v1785_v10, %v2159_v55 }
 0x189   :  { %v291_v28 = vmul.f32 0.03125, %v272_v25  ;;  %1796 = vrsqrt.f32 %v305_v7  ;;  %1568 = vmatmul.mubr.f32.vlgmr.msra.gmra.mrb[0].mxu0 %v372_v26  ;;  %v352_v29 = vmul.f32 %v2244_v50, %v330_v45 }
 0x18a   :  { %v1787_v32 = vpop.eup %1786  ;;  %v306_v33 = vadd.f32 1e-05, %v290_v27  ;;  %1570 = vmatprep.mubr.f32.mxu0 %v373_v37  ;;  %v353_v39 = vmul.f32 %v2244_v50, %v331_v30 }
 0x18b   :  { %v307_v13 = vadd.f32 1e-05, %v291_v28  ;;  %v1789_v12 = vpop.eup %1788  ;;  %v274_v14 = vpop.xlane.xlu1 %273  ;;  %v374_v46 = vadd.f32 %v2250_v19, %v352_v29  ;;  %v332_v40 = vmul.f32 %v1787_v32, %v2163_v56 }
 0x18c   :  { %v276_v38 = vpop.xlane.xlu0 %275  ;;  %1798 = vrsqrt.f32 %v306_v33  ;;  %v292_v41 = vmul.f32 0.03125, %v274_v14  ;;  %v333_v43 = vmul.f32 %v1789_v12, %v2173_v1  ;;  %v375_v55 = vadd.f32 %v2250_v19, %v353_v39 }
 0x18d   :  { %v293_v42 = vmul.f32 0.03125, %v276_v38  ;;  %1800 = vrsqrt.f32 %v307_v13  ;;  %1571 = vmatmul.mubr.f32.gmra.mrb[2].mxu0 %v374_v46  ;;  %v354_v16 = vmul.f32 %v2244_v50, %v332_v40 }
 0x18e   :  { %v1791_v44 = vpop.eup %1790  ;;  %v308_v15 = vadd.f32 1e-05, %v292_v41  ;;  %v355_v47 = vmul.f32 %v2244_v50, %v333_v43  ;;  %1573 = vmatprep.mubr.f32.mxu0 %v375_v55 }
 0x18f   :  { %v309_v17 = vadd.f32 1e-05, %v293_v42  ;;  %v1793_v51 = vpop.eup %1792  ;;  %v278_v52 = vpop.xlane.xlu1 %277  ;;  %v376_v56 = vadd.f32 %v2250_v19, %v354_v16  ;;  %v334_v53 = vmul.f32 %v1791_v44, %v2177_v2 }
 0x190   :  { %1802 = vrsqrt.f32 %v308_v15  ;;  %v294_v1 = vmul.f32 0.03125, %v278_v52  ;;  %v377_v54 = vadd.f32 %v2250_v19, %v355_v47  ;;  %v335_v57 = vmul.f32 %v1793_v51, %v2187_v9 }
 0x191   :  { %1804 = vrsqrt.f32 %v309_v17  ;;  %1574 = vmatmul.mubr.f32.gmra.mrb[4].mxu0 %v376_v56  ;;  %v356_v58 = vmul.f32 %v2244_v50, %v334_v53  ;;  %v1769_v56 = vld [vmem:[#allocation3 + $0x8] sm:$0xff]   ;;  %v1770_v53 = vld [vmem:[#allocation3 + $0x10] sm:$0xff]  }
 0x192   :  { %v1795_v18 = vpop.eup %1794  ;;  %v310_v20 = vadd.f32 1e-05, %v294_v1  ;;  %1576 = vmatprep.mubr.f32.mxu0 %v377_v54  ;;  %v357_v59 = vmul.f32 %v2244_v50, %v335_v57  ;;  %v1771_v1 = vld [vmem:[#allocation3 + $0x18] sm:$0xff]   ;;  %v1772_v54 = vld [vmem:[#allocation3 + $0x20] sm:$0xff]   ;;  %v1773_v57 = vld [vmem:[#allocation3 + $0x28] sm:$0xff]  }
 0x193   :  { %v1797_v62 = vpop.eup %1796  ;;  %v378_v63 = vadd.f32 %v2250_v19, %v356_v58  ;;  %v336_v2 = vmul.f32 %v1795_v18, %v2191_v11  ;;  %v1774_v58 = vld [vmem:[#allocation3 + $0x30] sm:$0xff]   ;;  %v1775_v18 = vld [vmem:[#allocation3 + $0x38] sm:$0xff]  }
 0x194   :  { %1806 = vrsqrt.f32 %v310_v20  ;;  %v379_v0 = vadd.f32 %v2250_v19, %v357_v59  ;;  %v337_v3 = vmul.f32 %v1797_v62, %v2201_v34  ;;  %v1334_v20 = vld [vmem:[%s2573_s5] ss:$0 sm:$0xff] }
 0x195   :  { %1577 = vmatmul.mubr.f32.gmra.mrb[6].mxu0 %v378_v63  ;;  %v358_v9 = vmul.f32 %v2244_v50, %v336_v2 }
 0x196   :  { %v1799_v36 = vpop.eup %1798  ;;  %1579 = vmatprep.mubr.f32.mxu0 %v379_v0  ;;  %v359_v4 = vmul.f32 %v2244_v50, %v337_v3 }
 0x197   :  { %v1801_v22 = vpop.eup %1800  ;;  %v380_v5 = vadd.f32 %v2250_v19, %v358_v9  ;;  %v338_v21 = vmul.f32 %v1799_v36, %v2205_v35 }
 0x198   :  { %v381_v23 = vadd.f32 %v2250_v19, %v359_v4  ;;  %v339_v11 = vmul.f32 %v1801_v22, %v2215_v48 }
 0x199   :  { %1580 = vmatmul.mubr.f32.gmra.mrb[8].mxu0 %v380_v5  ;;  %v360_v6 = vmul.f32 %v2244_v50, %v338_v21 }
 0x19a   :  { %v1803_v34 = vpop.eup %1802  ;;  %1582 = vmatprep.mubr.f32.mxu0 %v381_v23  ;;  %v361_v7 = vmul.f32 %v2244_v50, %v339_v11 }
 0x19b   :  { %v1805_v8 = vpop.eup %1804  ;;  %v382_v10 = vadd.f32 %v2250_v19, %v360_v6  ;;  %v340_v24 = vmul.f32 %v1803_v34, %v2219_v49 }
 0x19c   :  { %v383_v25 = vadd.f32 %v2250_v19, %v361_v7  ;;  %v341_v35 = vmul.f32 %v1805_v8, %v2229_v60  ;;  %v1768_v60 = vld [vmem:[#allocation3] sm:$0xff]  }
 0x19d   :  { %1583 = vmatmul.mubr.f32.gmra.mrb[10].mxu0 %v382_v10  ;;  %v362_v26 = vmul.f32 %v2244_v50, %v340_v24  ;;  %1607 = vmatprep.mubr.bf16.mxu1 %v1768_v60 }
 0x19e   :  { %v1807_v48 = vpop.eup %1806  ;;  %1585 = vmatprep.mubr.f32.mxu0 %v383_v25  ;;  %v363_v45 = vmul.f32 %v2244_v50, %v341_v35 }
 0x19f   :  { %v384_v27 = vadd.f32 %v2250_v19, %v362_v26  ;;  %v342_v28 = vmul.f32 %v1807_v48, %v2233_v61 }
 0x1a0   :  { %v385_v37 = vadd.f32 %v2250_v19, %v363_v45 }
 0x1a1   :  { %1586 = vmatmul.mubr.f32.gmra.mrb[12].mxu0 %v384_v27  ;;  %v364_v49 = vmul.f32 %v2244_v50, %v342_v28 }
 0x1a2   :  { %1588 = vmatprep.mubr.f32.mxu0 %v385_v37 }
 0x1a3   :  { %v386_v29 = vadd.f32 %v2250_v19, %v364_v49 }
 0x1a5   :  { %1589 = vmatmul.mubr.f32.gmra.mrb[14].mxu0 %v386_v29 }
 0x25c   :  { %v1569_v30 = vpop.f32.mrb[0].mxu0 }
 0x25d   :  { %v469_v32 = vpop.f32.mrb[1].mxu0 }
 0x25e   :  { %v548_v33 = vpack.c.bf16 %v1569_v30, %v469_v32 }
 0x260   :  { %v1572_v13 = vpop.f32.mrb[2].mxu0  ;;  %1591 = vmatprep.subr.bf16.mxu1 %v548_v33 }
 0x261   :  { %v479_v12 = vpop.f32.mrb[3].mxu0  ;;  %1592 = vmatpush3.bf16.msra.mxu1 %v548_v33 }
 0x262   :  { %v549_v14 = vpack.c.bf16 %v1572_v13, %v479_v12 }
 0x264   :  { %v1575_v61 = vpop.f32.mrb[4].mxu0  ;;  %1593 = vmatprep.subr.bf16.mxu1 %v549_v14 }
 0x265   :  { %v489_v38 = vpop.f32.mrb[5].mxu0  ;;  %1594 = vmatpush3.bf16.msra.mxu1 %v549_v14 }
 0x266   :  { %v550_v46 = vpack.c.bf16 %v1575_v61, %v489_v38 }
 0x268   :  { %v1578_v50 = vpop.f32.mrb[6].mxu0  ;;  %1595 = vmatprep.subr.bf16.mxu1 %v550_v46 }
 0x269   :  { %v499_v39 = vpop.f32.mrb[7].mxu0  ;;  %1596 = vmatpush3.bf16.msra.mxu1 %v550_v46 }
 0x26a   :  { %v551_v19 = vpack.c.bf16 %v1578_v50, %v499_v39 }
 0x26c   :  { %v1581_v40 = vpop.f32.mrb[8].mxu0  ;;  %1597 = vmatprep.subr.bf16.mxu1 %v551_v19 }
 0x26d   :  { %v509_v41 = vpop.f32.mrb[9].mxu0  ;;  %1598 = vmatpush3.bf16.msra.mxu1 %v551_v19 }
 0x26e   :  { %v552_v42 = vpack.c.bf16 %v1581_v40, %v509_v41 }
 0x270   :  { %v1584_v43 = vpop.f32.mrb[10].mxu0  ;;  %1599 = vmatprep.subr.bf16.mxu1 %v552_v42 }
 0x271   :  { %v519_v55 = vpop.f32.mrb[11].mxu0  ;;  %1600 = vmatpush3.bf16.msra.mxu1 %v552_v42 }
 0x272   :  { %v553_v16 = vpack.c.bf16 %v1584_v43, %v519_v55 }
 0x274   :  { %v1587_v44 = vpop.f32.mrb[12].mxu0  ;;  %1601 = vmatprep.subr.bf16.mxu1 %v553_v16 }
 0x275   :  { %v529_v15 = vpop.f32.mrb[13].mxu0  ;;  %1602 = vmatpush3.bf16.msra.mxu1 %v553_v16 }
 0x276   :  { %v554_v17 = vpack.c.bf16 %v1587_v44, %v529_v15 }
 0x278   :  { %v1590_v47 = vpop.f32.mrb[14].mxu0  ;;  %1603 = vmatprep.subr.bf16.mxu1 %v554_v17 }
 0x279   :  { %v539_v51 = vpop.f32.mrb[15].mxu0  ;;  %1604 = vmatpush3.bf16.msra.mxu1 %v554_v17 }
 0x27a   :  { %v555_v52 = vpack.c.bf16 %v1590_v47, %v539_v51 }
 0x27c   :  { %1605 = vmatprep.subr.bf16.mxu1 %v555_v52 }
 0x27d   :  { %1606 = vmatpush3.bf16.msra.mxu1 %v555_v52 }
 0x280   :  { %1608 = vmatmul.mubr.bf16.vlgmr.msra.gmra.mrb[0].mxu1 %v1769_v56 }
 0x281   :  { %1611 = vmatprep.mubr.bf16.mxu1 %v1770_v53 }
 0x288   :  { %1612 = vmatmul.mubr.bf16.gmra.mrb[4].mxu1 %v1771_v1 }
 0x289   :  { %1615 = vmatprep.mubr.bf16.mxu1 %v1772_v54 }
 0x290   :  { %1616 = vmatmul.mubr.bf16.gmra.mrb[8].mxu1 %v1773_v57 }
 0x291   :  { %1619 = vmatprep.mubr.bf16.mxu1 %v1774_v58 }
 0x298   :  { %1620 = vmatmul.mubr.bf16.gmra.mrb[12].mxu1 %v1775_v18 }
 0x353   :  { %v1609_v59 = vpop.f32.mrb[0].mxu1 }
 0x354   :  { %v2302_v62 = vadd.f32 %v1609_v59, %v1334_v20  ;;  %v670_v63 = vpop.f32.mrb[1].mxu1 }
 0x355   :  { %v1610_v2 = vpop.f32.mrb[2].mxu1  ;;  %v2305_v3 = vadd.f32 %v1334_v20, %v670_v63 }
 0x356   :  { %v809_v0 = vmax.f32 %v2302_v62, 0.0  ;;  %v673_v9 = vpop.f32.mrb[3].mxu1  ;;  %v2310_v4 = vadd.f32 %v1610_v2, %v1334_v20 }
 0x357   :  { %v807_v36 = vmax.f32 %v2305_v3, 0.0  ;;  %v2315_v11 = vadd.f32 %v1334_v20, %v673_v9 }
 0x358   :  { %830 = vadd.xlane.f32.xlu0 %v809_v0  ;;  %v810_v23 = vmax.f32 %v2310_v4, 0.0 }
 0x359   :  { %v808_v34 = vmax.f32 %v2315_v11, 0.0 }
 0x35b   :  { %v1613_v22 = vpop.f32.mrb[4].mxu1 }
 0x35c   :  { %826 = vadd.xlane.f32.xlu0 %v807_v36  ;;  %v686_v5 = vpop.f32.mrb[5].mxu1  ;;  %v2320_v7 = vadd.f32 %v1613_v22, %v1334_v20 }
 0x35d   :  { %v1614_v21 = vpop.f32.mrb[6].mxu1  ;;  %v2327_v26 = vadd.f32 %v1334_v20, %v686_v5 }
 0x35e   :  { %v689_v6 = vpop.f32.mrb[7].mxu1  ;;  %v813_v35 = vmax.f32 %v2320_v7, 0.0  ;;  %v2346_v33 = vadd.f32 %v1614_v21, %v1334_v20 }
 0x35f   :  { %v811_v28 = vmax.f32 %v2327_v26, 0.0  ;;  %v2337_v37 = vadd.f32 %v1334_v20, %v689_v6 }
 0x360   :  { %832 = vadd.xlane.f32.xlu0 %v810_v23  ;;  %v814_v46 = vmax.f32 %v2346_v33, 0.0 }
 0x361   :  { %v812_v13 = vmax.f32 %v2337_v37, 0.0 }
 0x363   :  { %v1617_v8 = vpop.f32.mrb[8].mxu1 }
 0x364   :  { %v2322_v10 = vadd.f32 %v1617_v8, %v1334_v20  ;;  %828 = vadd.xlane.f32.xlu0 %v808_v34  ;;  %v702_v24 = vpop.f32.mrb[9].mxu1 }
 0x365   :  { %v1618_v25 = vpop.f32.mrb[10].mxu1  ;;  %v2330_v45 = vadd.f32 %v1334_v20, %v702_v24 }
 0x366   :  { %v817_v48 = vmax.f32 %v2322_v10, 0.0  ;;  %v705_v27 = vpop.f32.mrb[11].mxu1  ;;  %v2340_v29 = vadd.f32 %v1618_v25, %v1334_v20  ;;  %v1062_v25 = vld [vmem:[#allocation9] sm:$0xff] }
 0x367   :  { %v815_v49 = vmax.f32 %v2330_v45, 0.0  ;;  %v2350_v14 = vadd.f32 %v1334_v20, %v705_v27 }
 0x368   :  { %838 = vadd.xlane.f32.xlu0 %v813_v35  ;;  %846 = vadd.xlane.f32.xlu1 %v817_v48  ;;  %v818_v12 = vmax.f32 %v2340_v29, 0.0 }
 0x369   :  { %v816_v50 = vmax.f32 %v2350_v14, 0.0  ;;  %v1068_v14 = vld [vmem:[#allocation9 + $0x30] sm:$0xff] }
 0x36b   :  { %v1621_v60 = vpop.f32.mrb[12].mxu1 }
 0x36c   :  { %834 = vadd.xlane.f32.xlu0 %v811_v28  ;;  %842 = vadd.xlane.f32.xlu1 %v815_v49  ;;  %v718_v30 = vpop.f32.mrb[13].mxu1  ;;  %v2356_v38 = vadd.f32 %v1621_v60, %v1334_v20 }
 0x36d   :  { %v1622_v32 = vpop.f32.mrb[14].mxu1  ;;  %v2365_v19 = vadd.f32 %v1334_v20, %v718_v30 }
 0x36e   :  { %v721_v61 = vpop.f32.mrb[15].mxu1  ;;  %v821_v39 = vmax.f32 %v2356_v38, 0.0  ;;  %v2374_v42 = vadd.f32 %v1622_v32, %v1334_v20 }
 0x36f   :  { %v819_v40 = vmax.f32 %v2365_v19, 0.0  ;;  %v2370_v41 = vadd.f32 %v1334_v20, %v721_v61 }
 0x370   :  { %836 = vadd.xlane.f32.xlu0 %v812_v13  ;;  %848 = vadd.xlane.f32.xlu1 %v818_v12  ;;  %v822_v55 = vmax.f32 %v2374_v42, 0.0 }
 0x371   :  { %v820_v43 = vmax.f32 %v2370_v41, 0.0 }
 0x374   :  { %840 = vadd.xlane.f32.xlu0 %v814_v46  ;;  %844 = vadd.xlane.f32.xlu1 %v816_v50 }
 0x378   :  { %854 = vadd.xlane.f32.xlu1 %v821_v39 }
 0x37c   :  { %850 = vadd.xlane.f32.xlu1 %v819_v40 }
 0x380   :  { %852 = vadd.xlane.f32.xlu1 %v820_v43 }
 0x384   :  { %856 = vadd.xlane.f32.xlu1 %v822_v55 }
 0x3e5   :  { %v831_v16 = vpop.xlane.xlu0 %830 }
 0x3e6   :  { %v860_v44 = vmul.f32 0.0625, %v831_v16 }
 0x3e8   :  { %v2385_v15 = vsub.f32 %v809_v0, %v860_v44  ;;  %v1065_v44 = vld [vmem:[#allocation9 + $0x18] sm:$0xff] }
 0x3e9   :  { %v827_v17 = vpop.xlane.xlu0 %826 }
 0x3ea   :  { %v858_v47 = vmul.f32 0.0625, %v827_v17  ;;  %v892_v51 = vsel %vm825_vm1, %v2385_v15, 0.0 }
 0x3eb   :  { %v908_v52 = vmul.f32 %v892_v51, %v892_v51 }
 0x3ec   :  { %v2392_v56 = vsub.f32 %v807_v36, %v858_v47 }
 0x3ed   :  { %v833_v53 = vpop.xlane.xlu0 %832  ;;  %926 = vadd.xlane.f32.xlu0 %v908_v52 }
 0x3ee   :  { %v861_v1 = vmul.f32 0.0625, %v833_v53  ;;  %v890_v54 = vsel %vm825_vm1, %v2392_v56, 0.0 }
 0x3ef   :  { %v906_v57 = vmul.f32 %v890_v54, %v890_v54 }
 0x3f0   :  { %v2399_v58 = vsub.f32 %v810_v23, %v861_v1 }
 0x3f1   :  { %v829_v18 = vpop.xlane.xlu0 %828  ;;  %922 = vadd.xlane.f32.xlu0 %v906_v57 }
 0x3f2   :  { %v859_v20 = vmul.f32 0.0625, %v829_v18  ;;  %v893_v59 = vsel %vm825_vm1, %v2399_v58, 0.0  ;;  %v1067_v18 = vld [vmem:[#allocation9 + $0x28] sm:$0xff] }
 0x3f3   :  { %v909_v62 = vmul.f32 %v893_v59, %v893_v59 }
 0x3f4   :  { %v2406_v63 = vsub.f32 %v808_v34, %v859_v20 }
 0x3f5   :  { %v839_v2 = vpop.xlane.xlu0 %838  ;;  %928 = vadd.xlane.f32.xlu0 %v909_v62  ;;  %v847_v0 = vpop.xlane.xlu1 %846 }
 0x3f6   :  { %v864_v3 = vmul.f32 0.0625, %v839_v2  ;;  %v868_v9 = vmul.f32 0.0625, %v847_v0  ;;  %v891_v36 = vsel %vm825_vm1, %v2406_v63, 0.0 }
 0x3f7   :  { %v907_v4 = vmul.f32 %v891_v36, %v891_v36 }
 0x3f8   :  { %v2413_v22 = vsub.f32 %v813_v35, %v864_v3  ;;  %v2417_v5 = vsub.f32 %v817_v48, %v868_v9  ;;  %v1063_v35 = vld [vmem:[#allocation9 + $0x8] sm:$0xff] }
 0x3f9   :  { %v835_v21 = vpop.xlane.xlu0 %834  ;;  %924 = vadd.xlane.f32.xlu0 %v907_v4  ;;  %v843_v23 = vpop.xlane.xlu1 %842  ;;  %v1711_v27 = vpack.c.bf16 %v1063_v35, %v1062_v25 }
 0x3fa   :  { %v862_v11 = vmul.f32 0.0625, %v835_v21  ;;  %v866_v6 = vmul.f32 0.0625, %v843_v23  ;;  %v896_v34 = vsel %vm825_vm1, %v2413_v22, 0.0  ;;  %v900_v8 = vsel %vm825_vm1, %v2417_v5, 0.0 }
 0x3fb   :  { %v912_v7 = vmul.f32 %v896_v34, %v896_v34  ;;  %v916_v24 = vmul.f32 %v900_v8, %v900_v8  ;;  %1712 = vmatprep.subr.bf16.mxu0 %v1711_v27  ;;  %1743 = vmatprep.subr.bf16.mxu1 %v1711_v27  ;;  %v1070_v34 = vld [vmem:[#allocation9 + $0x40] sm:$0xff]  ;;  %v1071_v8 = vld [vmem:[#allocation9 + $0x48] sm:$0xff] }
 0x3fc   :  { %v2427_v10 = vsub.f32 %v811_v28, %v862_v11  ;;  %v2431_v48 = vsub.f32 %v815_v49, %v866_v6  ;;  %1714 = vmatpush3.bf16.msra.mxu0 %v1711_v27  ;;  %v1064_v49 = vld [vmem:[#allocation9 + $0x10] sm:$0xff]  ;;  %1751 = vmatpush3.bf16.msra.mxu1 %v1711_v27 }
 0x3fd   :  { %934 = vadd.xlane.f32.xlu0 %v912_v7  ;;  %v837_v60 = vpop.xlane.xlu0 %836  ;;  %v849_v30 = vpop.xlane.xlu1 %848  ;;  %942 = vadd.xlane.f32.xlu1 %v916_v24  ;;  %v1715_v51 = vpack.c.bf16 %v1065_v44, %v1064_v49  ;;  %v1072_v27 = vld [vmem:[#allocation9 + $0x50] sm:$0xff] }
 0x3fe   :  { %v863_v32 = vmul.f32 0.0625, %v837_v60  ;;  %v869_v61 = vmul.f32 0.0625, %v849_v30  ;;  %v894_v16 = vsel %vm825_vm1, %v2427_v10, 0.0  ;;  %v898_v26 = vsel %vm825_vm1, %v2431_v48, 0.0  ;;  %v1073_v60 = vld [vmem:[#allocation9 + $0x58] sm:$0xff]  ;;  %v1076_v44 = vld [vmem:[#allocation9 + $0x70] sm:$0xff] }
 0x3ff   :  { %v910_v45 = vmul.f32 %v894_v16, %v894_v16  ;;  %v914_v28 = vmul.f32 %v898_v26, %v898_v26  ;;  %1716 = vmatprep.subr.bf16.mxu0 %v1715_v51  ;;  %1744 = vmatprep.subr.bf16.mxu1 %v1715_v51  ;;  %v1074_v26 = vld [vmem:[#allocation9 + $0x60] sm:$0xff] }
 0x400   :  { %v2441_v17 = vsub.f32 %v812_v13, %v863_v32  ;;  %v2445_v47 = vsub.f32 %v818_v12, %v869_v61  ;;  %1718 = vmatpush3.bf16.msra.mxu0 %v1715_v51  ;;  %v1066_v12 = vld [vmem:[#allocation9 + $0x20] sm:$0xff]  ;;  %1752 = vmatpush3.bf16.msra.mxu1 %v1715_v51  ;;  %v1077_v51 = vld [vmem:[#allocation9 + $0x78] sm:$0xff] }
 0x401   :  { %930 = vadd.xlane.f32.xlu0 %v910_v45  ;;  %v841_v52 = vpop.xlane.xlu0 %840  ;;  %v845_v53 = vpop.xlane.xlu1 %844  ;;  %938 = vadd.xlane.f32.xlu1 %v914_v28  ;;  %v1719_v62 = vpack.c.bf16 %v1067_v18, %v1066_v12  ;;  %v1075_v45 = vld [vmem:[#allocation9 + $0x68] sm:$0xff] }
 0x402   :  { %v865_v1 = vmul.f32 0.0625, %v841_v52  ;;  %v867_v54 = vmul.f32 0.0625, %v845_v53  ;;  %v895_v57 = vsel %vm825_vm1, %v2441_v17, 0.0  ;;  %v901_v37 = vsel %vm825_vm1, %v2445_v47, 0.0 }
 0x403   :  { %v911_v29 = vmul.f32 %v895_v57, %v895_v57  ;;  %v917_v13 = vmul.f32 %v901_v37, %v901_v37  ;;  %1720 = vmatprep.subr.bf16.mxu0 %v1719_v62  ;;  %1745 = vmatprep.subr.bf16.mxu1 %v1719_v62  ;;  %v1739_v52 = vpack.c.bf16 %v1077_v51, %v1076_v44 }
 0x404   :  { %v2455_v20 = vsub.f32 %v814_v46, %v865_v1  ;;  %v2459_v59 = vsub.f32 %v816_v50, %v867_v54  ;;  %1722 = vmatpush3.bf16.msra.mxu0 %v1719_v62  ;;  %v1069_v50 = vld [vmem:[#allocation9 + $0x38] sm:$0xff]  ;;  %1753 = vmatpush3.bf16.msra.mxu1 %v1719_v62 }
 0x405   :  { %932 = vadd.xlane.f32.xlu0 %v911_v29  ;;  %v855_v2 = vpop.xlane.xlu1 %854  ;;  %944 = vadd.xlane.f32.xlu1 %v917_v13  ;;  %v1723_v4 = vpack.c.bf16 %v1069_v50, %v1068_v14 }
 0x406   :  { %v872_v0 = vmul.f32 0.0625, %v855_v2  ;;  %v897_v3 = vsel %vm825_vm1, %v2455_v20, 0.0  ;;  %v899_v9 = vsel %vm825_vm1, %v2459_v59, 0.0 }
 0x407   :  { %v913_v33 = vmul.f32 %v897_v3, %v897_v3  ;;  %v915_v46 = vmul.f32 %v899_v9, %v899_v9  ;;  %1724 = vmatprep.subr.bf16.mxu0 %v1723_v4  ;;  %1746 = vmatprep.subr.bf16.mxu1 %v1723_v4 }
 0x408   :  { %v2469_v36 = vsub.f32 %v821_v39, %v872_v0  ;;  %1726 = vmatpush3.bf16.msra.mxu0 %v1723_v4  ;;  %1754 = vmatpush3.bf16.msra.mxu1 %v1723_v4  ;;  %v1727_v39 = vpack.c.bf16 %v1071_v8, %v1070_v34 }
 0x409   :  { %936 = vadd.xlane.f32.xlu0 %v913_v33  ;;  %v851_v21 = vpop.xlane.xlu1 %850  ;;  %940 = vadd.xlane.f32.xlu1 %v915_v46 }
 0x40a   :  { %v870_v23 = vmul.f32 0.0625, %v851_v21  ;;  %v904_v11 = vsel %vm825_vm1, %v2469_v36, 0.0  ;;  %1728 = vmatprep.subr.bf16.mxu0 %v1727_v39  ;;  %1747 = vmatprep.subr.bf16.mxu1 %v1727_v39 }
 0x40b   :  { %v920_v6 = vmul.f32 %v904_v11, %v904_v11 }
 0x40c   :  { %v2476_v38 = vsub.f32 %v819_v40, %v870_v23  ;;  %1730 = vmatpush3.bf16.msra.mxu0 %v1727_v39  ;;  %1755 = vmatpush3.bf16.msra.mxu1 %v1727_v39  ;;  %v1731_v40 = vpack.c.bf16 %v1073_v60, %v1072_v27  ;;  %v2499_v23 = vld [vmem:[%s2574_s6] ss:$0 sm:$0xff]  ;;  %s1966_s6 = smov [#allocation11]  }
 0x40d   :  { %950 = vadd.xlane.f32.xlu1 %v920_v6  ;;  %v853_v7 = vpop.xlane.xlu1 %852  ;;  %v2505_v39 = vld [vmem:[%s2575_s7] ss:$0 sm:$0xff]  ;;  %s1308_s7 = sshll.u32 %s1966_s6, 4  ;;  %s1309_s7 = int_to_ptr.vmem [resolvable:$true] %s1308_s7 }
 0x40e   :  { %v871_v24 = vmul.f32 0.0625, %v853_v7  ;;  %v902_v25 = vsel %vm825_vm1, %v2476_v38, 0.0  ;;  %1732 = vmatprep.subr.bf16.mxu0 %v1731_v40  ;;  %1748 = vmatprep.subr.bf16.mxu1 %v1731_v40  ;;  %s1928_s0 = scalar_lea.vmem %s1309_s7, 1024  ;;  %p1933_p5 = scmp.lt.s32.totalorder %s1309_s7, %s1309_s7 }
 0x40f   :  { %v918_v35 = vmul.f32 %v902_v25, %v902_v25  ;;  %p1929_p4 = scmp.ne.s32.totalorder %s1309_s7, %s1928_s0  ;;  %p1934_p6 = scmp.lt.s32.totalorder %s1928_s0, %s1928_s0 }
 0x410   :  { %v2483_v19 = vsub.f32 %v820_v43, %v871_v24  ;;  %1734 = vmatpush3.bf16.msra.mxu0 %v1731_v40  ;;  %1756 = vmatpush3.bf16.msra.mxu1 %v1731_v40  ;;  %v1735_v43 = vpack.c.bf16 %v1075_v45, %v1074_v26 }
 0x411   :  { %946 = vadd.xlane.f32.xlu1 %v918_v35  ;;  %v857_v30 = vpop.xlane.xlu1 %856  ;;  %p1935_p7 = por %p1934_p6, %p1933_p5 }
 0x412   :  { %v873_v32 = vmul.f32 0.0625, %v857_v30  ;;  %v903_v61 = vsel %vm825_vm1, %v2483_v19, 0.0  ;;  %1736 = vmatprep.subr.bf16.mxu0 %v1735_v43  ;;  %1749 = vmatprep.subr.bf16.mxu1 %v1735_v43 }
 0x413   :  { %v919_v16 = vmul.f32 %v903_v61, %v903_v61  ;;  %p1936_p8 = pnand %p1935_p7, %p1929_p4 }
 0x414   :  { %v2490_v41 = vsub.f32 %v822_v55, %v873_v32  ;;  %1738 = vmatpush3.bf16.msra.mxu0 %v1735_v43  ;;  %1757 = vmatpush3.bf16.msra.mxu1 %v1735_v43 }
 0x415   :  { %948 = vadd.xlane.f32.xlu1 %v919_v16  ;;  %1740 = vmatprep.subr.bf16.mxu0 %v1739_v52 }
 0x416   :  { %v905_v28 = vsel %vm825_vm1, %v2490_v41, 0.0  ;;  %1750 = vmatprep.subr.bf16.mxu1 %v1739_v52 }
 0x417   :  { %v921_v49 = vmul.f32 %v905_v28, %v905_v28 }
 0x418   :  { %1742 = vmatpush3.bf16.msra.mxu0 %v1739_v52  ;;  %1758 = vmatpush3.bf16.msra.mxu1 %v1739_v52 }
 0x419   :  { %952 = vadd.xlane.f32.xlu1 %v921_v49 }
 0x47a   :  { %v927_v42 = vpop.xlane.xlu0 %926 }
 0x47b   :  { %v956_v55 = vmul.f32 0.0625, %v927_v42 }
 0x47d   :  { %v972_v31 = vadd.f32 1e-05, %v956_v55 }
 0x47e   :  { %v923_v53 = vpop.xlane.xlu0 %922 }
 0x47f   :  { %v954_v1 = vmul.f32 0.0625, %v923_v53 }
 0x481   :  { %v970_v54 = vadd.f32 1e-05, %v954_v1 }
 0x482   :  { %v929_v57 = vpop.xlane.xlu0 %928 }
 0x483   :  { %1808 = vrsqrt.f32 %v970_v54  ;;  %v957_v37 = vmul.f32 0.0625, %v929_v57 }
 0x484   :  { %1810 = vrsqrt.f32 %v972_v31 }
 0x485   :  { %v973_v29 = vadd.f32 1e-05, %v957_v37 }
 0x486   :  { %v925_v13 = vpop.xlane.xlu0 %924 }
 0x487   :  { %v955_v12 = vmul.f32 0.0625, %v925_v13  ;;  %1812 = vrsqrt.f32 %v973_v29 }
 0x489   :  { %v971_v18 = vadd.f32 1e-05, %v955_v12 }
 0x48a   :  { %v935_v62 = vpop.xlane.xlu0 %934  ;;  %v943_v2 = vpop.xlane.xlu1 %942 }
 0x48b   :  { %1814 = vrsqrt.f32 %v971_v18  ;;  %v960_v0 = vmul.f32 0.0625, %v935_v62  ;;  %v964_v33 = vmul.f32 0.0625, %v943_v2 }
 0x48d   :  { %v1809_v3 = vpop.eup %1808  ;;  %v976_v9 = vadd.f32 1e-05, %v960_v0  ;;  %v980_v7 = vadd.f32 1e-05, %v964_v33 }
 0x48e   :  { %v931_v46 = vpop.xlane.xlu0 %930  ;;  %v939_v14 = vpop.xlane.xlu1 %938  ;;  %v1002_v50 = vmul.f32 %v1809_v3, %v2392_v56 }
 0x48f   :  { %v958_v4 = vmul.f32 0.0625, %v931_v46  ;;  %v962_v21 = vmul.f32 0.0625, %v939_v14  ;;  %v1811_v11 = vpop.eup %1810  ;;  %1816 = vrsqrt.f32 %v976_v9 }
 0x490   :  { %v1024_v6 = vmul.f32 %v2499_v23, %v1002_v50  ;;  %v1004_v40 = vmul.f32 %v1811_v11, %v2385_v15 }
 0x491   :  { %v974_v34 = vadd.f32 1e-05, %v958_v4  ;;  %v978_v8 = vadd.f32 1e-05, %v962_v21  ;;  %v1813_v35 = vpop.eup %1812 }
 0x492   :  { %v933_v56 = vpop.xlane.xlu0 %932  ;;  %v945_v24 = vpop.xlane.xlu1 %944  ;;  %v1046_v25 = vadd.f32 %v2505_v39, %v1024_v6  ;;  %v1005_v43 = vmul.f32 %v1813_v35, %v2399_v58  ;;  %v1026_v44 = vmul.f32 %v2499_v23, %v1004_v40 }
 0x493   :  { %1818 = vrsqrt.f32 %v974_v34  ;;  %v959_v27 = vmul.f32 0.0625, %v933_v56  ;;  %v965_v60 = vmul.f32 0.0625, %v945_v24 }
 0x494   :  { %1820 = vrsqrt.f32 %v978_v8  ;;  %1655 = vmatprep.mubr.f32.mxu0 %v1046_v25  ;;  %v1048_v58 = vadd.f32 %v2505_v39, %v1026_v44 }
 0x495   :  { %v1815_v30 = vpop.eup %1814  ;;  %v975_v32 = vadd.f32 1e-05, %v959_v27  ;;  %1822 = vrsqrt.f32 %v980_v7  ;;  %v981_v16 = vadd.f32 1e-05, %v965_v60 }
 0x496   :  { %v1003_v61 = vmul.f32 %v1815_v30, %v2406_v63  ;;  %v937_v26 = vpop.xlane.xlu0 %936  ;;  %v941_v45 = vpop.xlane.xlu1 %940  ;;  %v1027_v63 = vmul.f32 %v2499_v23, %v1005_v43 }
 0x497   :  { %1824 = vrsqrt.f32 %v975_v32  ;;  %v961_v28 = vmul.f32 0.0625, %v937_v26  ;;  %v963_v49 = vmul.f32 0.0625, %v941_v45 }
 0x498   :  { %v1025_v51 = vmul.f32 %v2499_v23, %v1003_v61  ;;  %1826 = vrsqrt.f32 %v981_v16  ;;  %v1049_v29 = vadd.f32 %v2505_v39, %v1027_v63 }
 0x499   :  { %v977_v15 = vadd.f32 1e-05, %v961_v28  ;;  %v979_v52 = vadd.f32 1e-05, %v963_v49  ;;  %v1817_v53 = vpop.eup %1816 }
 0x49a   :  { %v951_v42 = vpop.xlane.xlu1 %950  ;;  %v1047_v55 = vadd.f32 %v2505_v39, %v1025_v51  ;;  %v1008_v12 = vmul.f32 %v1817_v53, %v2413_v22 }
 0x49b   :  { %1828 = vrsqrt.f32 %v977_v15  ;;  %v968_v1 = vmul.f32 0.0625, %v951_v42 }
 0x49c   :  { %1830 = vrsqrt.f32 %v979_v52  ;;  %1656 = vmatmul.mubr.f32.vlgmr.msra.gmra.mrb[16].mxu0 %v1047_v55 }
 0x49d   :  { %v1819_v54 = vpop.eup %1818  ;;  %1658 = vmatprep.mubr.f32.mxu0 %v1048_v58  ;;  %v984_v57 = vadd.f32 1e-05, %v968_v1 }
 0x49e   :  { %v1821_v31 = vpop.eup %1820  ;;  %v947_v37 = vpop.xlane.xlu1 %946  ;;  %v1006_v13 = vmul.f32 %v1819_v54, %v2427_v10  ;;  %v1030_v10 = vmul.f32 %v2499_v23, %v1008_v12 }
 0x49f   :  { %v966_v18 = vmul.f32 0.0625, %v947_v37  ;;  %v1010_v62 = vmul.f32 %v1821_v31, %v2431_v48  ;;  %v1823_v2 = vpop.eup %1822  ;;  %1832 = vrsqrt.f32 %v984_v57 }
 0x4a0   :  { %1659 = vmatmul.mubr.f32.gmra.mrb[18].mxu0 %v1049_v29  ;;  %v1028_v0 = vmul.f32 %v2499_v23, %v1006_v13  ;;  %v1012_v11 = vmul.f32 %v1823_v2, %v2417_v5 }
 0x4a1   :  { %v1825_v3 = vpop.eup %1824  ;;  %v982_v9 = vadd.f32 1e-05, %v966_v18  ;;  %v1032_v33 = vmul.f32 %v2499_v23, %v1010_v62 }
 0x4a2   :  { %v949_v46 = vpop.xlane.xlu1 %948  ;;  %v1050_v14 = vadd.f32 %v2505_v39, %v1028_v0  ;;  %v1007_v50 = vmul.f32 %v1825_v3, %v2441_v17  ;;  %v1827_v4 = vpop.eup %1826  ;;  %v1052_v17 = vadd.f32 %v2505_v39, %v1030_v10  ;;  %v1034_v60 = vmul.f32 %v2499_v23, %v1012_v11 }
 0x4a3   :  { %1834 = vrsqrt.f32 %v982_v9  ;;  %v967_v22 = vmul.f32 0.0625, %v949_v46  ;;  %v1054_v48 = vadd.f32 %v2505_v39, %v1032_v33  ;;  %v1013_v27 = vmul.f32 %v1827_v4, %v2445_v47 }
 0x4a4   :  { %1661 = vmatprep.mubr.f32.mxu0 %v1050_v14  ;;  %v1029_v21 = vmul.f32 %v2499_v23, %v1007_v50  ;;  %v1056_v47 = vadd.f32 %v2505_v39, %v1034_v60 }
 0x4a5   :  { %v1829_v6 = vpop.eup %1828  ;;  %v983_v34 = vadd.f32 1e-05, %v967_v22  ;;  %1667 = vmatprep.mubr.f32.mxu1 %v1054_v48 }
 0x4a6   :  { %v1831_v8 = vpop.eup %1830  ;;  %v953_v7 = vpop.xlane.xlu1 %952  ;;  %v1051_v56 = vadd.f32 %v2505_v39, %v1029_v21  ;;  %v1009_v24 = vmul.f32 %v1829_v6, %v2455_v20 }
 0x4a7   :  { %v1011_v25 = vmul.f32 %v1831_v8, %v2459_v59  ;;  %1836 = vrsqrt.f32 %v983_v34  ;;  %v969_v35 = vmul.f32 0.0625, %v953_v7  ;;  %v1035_v59 = vmul.f32 %v2499_v23, %v1013_v27 }
 0x4a8   :  { %1662 = vmatmul.mubr.f32.gmra.mrb[20].mxu0 %v1051_v56  ;;  %v1031_v5 = vmul.f32 %v2499_v23, %v1009_v24 }
 0x4a9   :  { %v985_v40 = vadd.f32 1e-05, %v969_v35  ;;  %1664 = vmatprep.mubr.f32.mxu0 %v1052_v17  ;;  %v1033_v30 = vmul.f32 %v2499_v23, %v1011_v25  ;;  %v1833_v61 = vpop.eup %1832  ;;  %v1057_v45 = vadd.f32 %v2505_v39, %v1035_v59 }
 0x4aa   :  { %v1053_v32 = vadd.f32 %v2505_v39, %v1031_v5  ;;  %v1016_v43 = vmul.f32 %v1833_v61, %v2469_v36 }
 0x4ab   :  { %1838 = vrsqrt.f32 %v985_v40  ;;  %v1055_v20 = vadd.f32 %v2505_v39, %v1033_v30 }
 0x4ac   :  { %1665 = vmatmul.mubr.f32.gmra.mrb[22].mxu0 %v1053_v32  ;;  %v1038_v15 = vmul.f32 %v2499_v23, %v1016_v43 }
 0x4ad   :  { %v1835_v16 = vpop.eup %1834  ;;  %1668 = vmatmul.mubr.f32.vlgmr.msra.gmra.mrb[16].mxu1 %v1055_v20 }
 0x4ae   :  { %1670 = vmatprep.mubr.f32.mxu1 %v1056_v47  ;;  %v1014_v26 = vmul.f32 %v1835_v16, %v2476_v38  ;;  %v1060_v36 = vadd.f32 %v2505_v39, %v1038_v15 }
 0x4b0   :  { %v1036_v28 = vmul.f32 %v2499_v23, %v1014_v26 }
 0x4b1   :  { %v1837_v49 = vpop.eup %1836  ;;  %1671 = vmatmul.mubr.f32.gmra.mrb[18].mxu1 %v1057_v45 }
 0x4b2   :  { %v1058_v44 = vadd.f32 %v2505_v39, %v1036_v28  ;;  %v1015_v51 = vmul.f32 %v1837_v49, %v2483_v19 }
 0x4b4   :  { %1673 = vmatprep.mubr.f32.mxu1 %v1058_v44  ;;  %v1037_v52 = vmul.f32 %v2499_v23, %v1015_v51 }
 0x4b5   :  { %v1839_v42 = vpop.eup %1838 }
 0x4b6   :  { %v1059_v38 = vadd.f32 %v2505_v39, %v1037_v52  ;;  %v1017_v55 = vmul.f32 %v1839_v42, %v2490_v41 }
 0x4b8   :  { %1674 = vmatmul.mubr.f32.gmra.mrb[20].mxu1 %v1059_v38  ;;  %v1039_v63 = vmul.f32 %v2499_v23, %v1017_v55 }
 0x4b9   :  { %1676 = vmatprep.mubr.f32.mxu1 %v1060_v36 }
 0x4ba   :  { %v1061_v53 = vadd.f32 %v2505_v39, %v1039_v63 }
 0x4bc   :  { %1677 = vmatmul.mubr.f32.gmra.mrb[22].mxu1 %v1061_v53 }
 0x56f   :  { %v1657_v19 = vpop.f32.mrb[16].mxu0 }
 0x570   :  { %v1144_v1 = vpop.f32.mrb[17].mxu0 }
 0x571   :  { %v1404_v58 = vpack.c.bf16 %v1657_v19, %v1144_v1 }
 0x573   :  { %1405 = vst [vmem:[#allocation11] sm:$0xff] %v1404_v58   ;;  %v1660_v54 = vpop.f32.mrb[18].mxu0 }
 0x574   :  { %v1154_v31 = vpop.f32.mrb[19].mxu0 }
 0x575   :  { %v1409_v57 = vpack.c.bf16 %v1660_v54, %v1154_v31 }
 0x577   :  { %1448 = vst [vmem:[#allocation11 + $0x8] sm:$0xff] %v1409_v57  }
 0x57b   :  { %v1663_v37 = vpop.f32.mrb[20].mxu0 }
 0x57c   :  { %v1164_v29 = vpop.f32.mrb[21].mxu0 }
 0x57d   :  { %v1414_v41 = vpack.c.bf16 %v1663_v37, %v1164_v29 }
 0x57f   :  { %1449 = vst [vmem:[#allocation11 + $0x10] sm:$0xff] %v1414_v41   ;;  %v1666_v13 = vpop.f32.mrb[22].mxu0 }
 0x580   :  { %v1669_v12 = vpop.f32.mrb[16].mxu1  ;;  %v1174_v18 = vpop.f32.mrb[23].mxu0 }
 0x581   :  { %v1419_v23 = vpack.c.bf16 %v1666_v13, %v1174_v18  ;;  %v1184_v62 = vpop.f32.mrb[17].mxu1 }
 0x582   :  { %v1424_v2 = vpack.c.bf16 %v1669_v12, %v1184_v62 }
 0x583   :  { %1450 = vst [vmem:[#allocation11 + $0x18] sm:$0xff] %v1419_v23  }
 0x584   :  { %1451 = vst [vmem:[#allocation11 + $0x20] sm:$0xff] %v1424_v2   ;;  %v1672_v39 = vpop.f32.mrb[18].mxu1 }
 0x585   :  { %v1194_v0 = vpop.f32.mrb[19].mxu1 }
 0x586   :  { %v1429_v3 = vpack.c.bf16 %v1672_v39, %v1194_v0 }
 0x588   :  { %1452 = vst [vmem:[#allocation11 + $0x28] sm:$0xff] %v1429_v3  }
 0x58b   :  { %v1675_v9 = vpop.f32.mrb[20].mxu1 }
 0x58c   :  { %v1204_v33 = vpop.f32.mrb[21].mxu1 }
 0x58d   :  { %v1434_v46 = vpack.c.bf16 %v1675_v9, %v1204_v33 }
 0x58f   :  { %1453 = vst [vmem:[#allocation11 + $0x30] sm:$0xff] %v1434_v46   ;;  %v1678_v14 = vpop.f32.mrb[22].mxu1 }
 0x590   :  { %v1214_v50 = vpop.f32.mrb[23].mxu1 }
 0x591   :  { %v1439_v10 = vpack.c.bf16 %v1678_v14, %v1214_v50 }
 0x593   :  { %1454 = vst [vmem:[#allocation11 + $0x38] sm:$0xff] %v1439_v10  }
 0x594   :  { %1939 = shalt.err (!%p1936_p8)
}
 0x595   :  { %s1940_s27 = scalar_lea.hbm %s2577_s9, 1024 }
 0x596   :  { %p1941_p9 = scmp.ne.s32.totalorder %s2577_s9, %s1940_s27  ;;  %p1944_p10 = scmp.lt.u32.totalorder %s1940_s27, %s2577_s9 }
 0x598   :  { %p1946_p11 = pnand %p1944_p10, %p1941_p9 }
 0x59a   :  { %1949 = shalt.err (!%p1946_p11)
}
 0x59b   :  { %1314 = dma.vmem_to_hbm [thread:$0]  %s1309_s7, 1024, %s2577_s9, [#allocation5], %s1960_s21, %s1960_s21, %s1961_s22  }
 0x59c   :  { %1956 = dma.done.wait [#allocation5], 1024  }
 0x59d   :  { %1957 = vsyncadd [#allocation5], 4294966272 }
 0x59e   :  { %1318 = vsyncpa [#allocation4], 1 }
 0x59f   :  { %1319 = vsyncpa [#allocation7], 1 }
 0x5a0   :  { %1320 = vsyncpa [#allocation10], 1 }
 0x5a1   :  { %1321 = vsyncpa [#allocation5], 1 }

</bundles_post_ra>
